<compile_context>
chip_gen: v6e
topology: v6e:2x2x1
jax: 0.10.0
libtpu: 0.0.40
codegen_flags: <defaults>
</compile_context>

<pallas_src>
import functools

import jax
import jax.numpy as jnp
from jax.experimental import pallas as pl
from jax.experimental.pallas import tpu as pltpu

_VMEM_LIMIT = 64 * 1024 * 1024


def _round_up(x, m):
    return -(-x // m) * m


def _log_softmax(logits):
    m = jnp.max(logits, axis=1, keepdims=True)
    z = logits - m
    return z - jnp.log(jnp.sum(jnp.exp(z), axis=1, keepdims=True))


def _pool_onehot(ids_row, g_pad):
    """(g_pad, tm) one-hot selecting each graph's nodes; sentinel ids drop out."""
    tm = ids_row.shape[-1]
    gids = jax.lax.broadcasted_iota(jnp.int32, (g_pad, tm), 0)
    return (gids == ids_row).astype(jnp.float32)


# --------------------------------- kernels ----------------------------------

def _conv1_kernel(adj_ref, xw1_ref, b1_ref, w2_ref, out_ref, acc_ref):
    """out = relu(adj @ xw1 + b1) @ w2, tiled over (row tile, K tile)."""
    k = pl.program_id(1)

    @pl.when(k == 0)
    def _():
        acc_ref[...] = jnp.zeros_like(acc_ref)

    acc_ref[...] += jnp.dot(adj_ref[...], xw1_ref[...],
                            preferred_element_type=jnp.float32)

    @pl.when(k == pl.num_programs(1) - 1)
    def _():
        x1 = jnp.maximum(acc_ref[...] + b1_ref[...], 0.0)         # (tm, H1p) f32
        # Layer-2 weight folded into the epilogue: one tiny matmul per row tile.
        out_ref[...] = jnp.dot(x1.astype(out_ref.dtype), w2_ref[...],
                               preferred_element_type=jnp.float32
                               ).astype(out_ref.dtype)


def _conv2_pool_kernel(adj_ref, x1w2_ref, b2_ref, idx_ref, out_ref, acc_ref):
    """Per-row-tile pooled partials of relu(adj @ x1w2 + b2).

    Output block (i, 0, 0) -> row axis carries no state, so it can be sharded
    across TensorCores (v7x megacore)."""
    k = pl.program_id(1)

    @pl.when(k == 0)
    def _():
        acc_ref[...] = jnp.zeros_like(acc_ref)

    acc_ref[...] += jnp.dot(adj_ref[...], x1w2_ref[...],
                            preferred_element_type=jnp.float32)

    @pl.when(k == pl.num_programs(1) - 1)
    def _():
        x2 = jnp.maximum(acc_ref[...] + b2_ref[...], 0.0)         # (tm, H2p) f32
        onehot = _pool_onehot(idx_ref[...], out_ref.shape[0])     # (Gp, tm)
        out_ref[...] = jnp.dot(onehot, x2, preferred_element_type=jnp.float32)


def _head_kernel(pp_ref, w3_ref, b3_ref, w4_ref, b4_ref, out_ref):
    """Reduce pooled partials, MLP head, log_softmax (tiny, gridless)."""
    pooled = jnp.sum(pp_ref[...], axis=0)                          # (Gp, H2p)
    h = jnp.maximum(jnp.dot(pooled, w3_ref[...],
                            preferred_element_type=jnp.float32) + b3_ref[...], 0.0)
    logits = jnp.dot(h, w4_ref[...],
                     preferred_element_type=jnp.float32) + b4_ref[...]
    out_ref[...] = _log_softmax(logits)


def _fused_kernel(adj_ref, xw1_ref, b1_ref, w2_ref, b2_ref, idx_ref,
                  w3_ref, b3_ref, w4_ref, b4_ref, out_ref):
    """Whole forward with adj resident in VMEM (adj read from HBM once)."""
    adj = adj_ref[...]
    x1 = jnp.maximum(jnp.dot(adj, xw1_ref[...],
                             preferred_element_type=jnp.float32) + b1_ref[...], 0.0)
    x1w2 = jnp.dot(x1.astype(adj.dtype), w2_ref[...],
                   preferred_element_type=jnp.float32).astype(adj.dtype)
    x2 = jnp.maximum(jnp.dot(adj, x1w2,
                             preferred_element_type=jnp.float32) + b2_ref[...], 0.0)
    onehot = _pool_onehot(idx_ref[...], out_ref.shape[0])
    pooled = jnp.dot(onehot, x2, preferred_element_type=jnp.float32)
    h = jnp.maximum(jnp.dot(pooled, w3_ref[...],
                            preferred_element_type=jnp.float32) + b3_ref[...], 0.0)
    logits = jnp.dot(h, w4_ref[...],
                     preferred_element_type=jnp.float32) + b4_ref[...]
    out_ref[...] = _log_softmax(logits)


# --------------------------------- wrapper ----------------------------------

def _choose_tile(n, target=1024):
    """Largest multiple-of-128 tile <= target with small zero-padding overhead."""
    cap = min(target, _round_up(n, 128))
    max_pad = max(127, n // 16)
    t = cap
    while t >= 128:
        if _round_up(n, t) - n <= max_pad:
            return t
        t -= 128
    return 128


@functools.partial(jax.jit,
                   static_argnames=("num_graphs", "tile", "compute_dtype", "fuse"))
def gnn_forward(x_in, adj, idx, params, *, num_graphs, tile=None,
                compute_dtype=jnp.bfloat16, fuse=None):
    """params = (w1,b1,w2,b2,w3,b3,w4,b4); weights [in,out], biases [1,out].

    Matches GNN.forward.
    TODO(synk): PyTorch derives num_graphs = max(idx)+1 at runtime; it is a
    static argument here (idx values outside [0, num_graphs) drop out of the
    pooling, same as segment_sum).
    """
    w1, b1, w2, b2, w3, b3, w4, b4 = params
    n = adj.shape[0]
    h1 = w1.shape[1]
    h2 = w2.shape[1]
    n_class = w4.shape[1]

    h1_pad = _round_up(h1, 128)
    h2_pad = _round_up(h2, 128)
    g_pad = max(8, _round_up(num_graphs, 8))

    if tile is None:
        tile = _choose_tile(n)
    n_pad = _round_up(n, tile)
    grid = (n_pad // tile, n_pad // tile)
    esize = jnp.dtype(compute_dtype).itemsize

    # ---- padding: hidden dims to 128 lanes; nodes to a tile multiple --------
    w1p = jnp.pad(w1, ((0, 0), (0, h1_pad - h1)))
    b1p = jnp.pad(b1, ((0, 0), (0, h1_pad - h1)))
    w2p = jnp.pad(w2, ((0, h1_pad - h1), (0, h2_pad - h2))).astype(compute_dtype)
    b2p = jnp.pad(b2, ((0, 0), (0, h2_pad - h2)))
    w3p = jnp.pad(w3, ((0, h2_pad - h2), (0, 0)))

    # TODO(synk): int8 adj on v5e/v6e (fp8 on v7x) would halve the dominant HBM
    # stream; needs an accuracy validation pass first.
    adj_c = jnp.pad(adj, ((0, n_pad - n), (0, n_pad - n))).astype(compute_dtype)
    x_pad = jnp.pad(x_in, ((0, n_pad - n), (0, 0)))
    idx_pad = jnp.pad(idx.astype(jnp.int32), (0, n_pad - n), constant_values=g_pad)
    idx2d = idx_pad.reshape(1, n_pad)

    # Thin first matmul hoisted out of the kernels (trivial XLA matmul).
    xw1 = jnp.dot(x_pad, w1p,
                  precision=jax.lax.Precision.HIGHEST).astype(compute_dtype)

    if fuse is None:
        est = (n_pad * n_pad * esize
               + n_pad * (h1_pad + h2_pad) * (esize + 4)
               + g_pad * n_pad * 4)
        fuse = est <= 20 * 1024 * 1024

    if fuse:
        # adj resident in VMEM: read from HBM once for both conv layers.
        out_pad = pl.pallas_call(
            _fused_kernel,
            out_shape=jax.ShapeDtypeStruct((g_pad, n_class), jnp.float32),
            compiler_params=pltpu.CompilerParams(vmem_limit_bytes=_VMEM_LIMIT),
        )(adj_c, xw1, b1p, w2p, b2p, idx2d, w3p, b3, w4, b4)
        return out_pad[:num_graphs]

    # ---- layer 1: x1w2 = relu(adj @ xw1 + b1) @ w2, tiled over adj -----------
    x1w2 = pl.pallas_call(
        _conv1_kernel,
        out_shape=jax.ShapeDtypeStruct((n_pad, h2_pad), compute_dtype),
        grid_spec=pltpu.PrefetchScalarGridSpec(
            num_scalar_prefetch=0,
            grid=grid,
            in_specs=[
                pl.BlockSpec((tile, tile), lambda i, k: (i, k)),       # adj
                pl.BlockSpec((tile, h1_pad), lambda i, k: (k, 0)),     # xw1
                pl.BlockSpec((1, h1_pad), lambda i, k: (0, 0)),        # b1
                pl.BlockSpec((h1_pad, h2_pad), lambda i, k: (0, 0)),   # w2
            ],
            out_specs=pl.BlockSpec((tile, h2_pad), lambda i, k: (i, 0)),
            scratch_shapes=[pltpu.VMEM((tile, h1_pad), jnp.float32)],
        ),
        compiler_params=pltpu.CompilerParams(
            dimension_semantics=("parallel", "arbitrary"),
            vmem_limit_bytes=_VMEM_LIMIT),
        cost_estimate=pl.CostEstimate(
            flops=2 * n_pad * n_pad * h1_pad + 2 * n_pad * h1_pad * h2_pad,
            transcendentals=0,
            bytes_accessed=(n_pad * n_pad + grid[0] * n_pad * h1_pad
                            + n_pad * h2_pad) * esize),
    )(adj_c, xw1, b1p, w2p)

    # ---- layer 2: per-row-tile pooled partials (row axis megacore-parallel) --
    pooled_parts = pl.pallas_call(
        _conv2_pool_kernel,
        out_shape=jax.ShapeDtypeStruct((grid[0], g_pad, h2_pad), jnp.float32),
        grid_spec=pltpu.PrefetchScalarGridSpec(
            num_scalar_prefetch=0,
            grid=grid,
            in_specs=[
                pl.BlockSpec((tile, tile), lambda i, k: (i, k)),       # adj
                pl.BlockSpec((tile, h2_pad), lambda i, k: (k, 0)),     # x1w2
                pl.BlockSpec((1, h2_pad), lambda i, k: (0, 0)),        # b2
                pl.BlockSpec((1, tile), lambda i, k: (0, i)),          # idx row tile
            ],
            out_specs=pl.BlockSpec((None, g_pad, h2_pad),
                                   lambda i, k: (i, 0, 0)),
            scratch_shapes=[pltpu.VMEM((tile, h2_pad), jnp.float32)],
        ),
        compiler_params=pltpu.CompilerParams(
            dimension_semantics=("parallel", "arbitrary"),
            vmem_limit_bytes=_VMEM_LIMIT),
        cost_estimate=pl.CostEstimate(
            flops=2 * n_pad * n_pad * h2_pad + 2 * g_pad * n_pad * h2_pad,
            transcendentals=0,
            bytes_accessed=(n_pad * n_pad + grid[0] * n_pad * h2_pad) * esize
                           + grid[0] * g_pad * h2_pad * 4),
    )(adj_c, x1w2, b2p, idx2d)

    # ---- tiny partial reduce + MLP head + log_softmax (gridless micro-kernel)
    out_pad = pl.pallas_call(
        _head_kernel,
        out_shape=jax.ShapeDtypeStruct((g_pad, n_class), jnp.float32),
        compiler_params=pltpu.CompilerParams(vmem_limit_bytes=_VMEM_LIMIT),
    )(pooled_parts, w3p, b3, w4, b4)

    return out_pad[:num_graphs]


# ----------------------------------- demo ------------------------------------

def _init_linear(key, in_dim, out_dim):
    kw, kb = jax.random.split(key)
    bound = 1.0 / jnp.sqrt(in_dim)
    w = jax.random.uniform(kw, (in_dim, out_dim), jnp.float32, -bound, bound)
    b = jax.random.uniform(kb, (1, out_dim), jnp.float32, -bound, bound)
    return w, b


if __name__ == "__main__":
    N = 300                  # not a multiple of 128 -> exercises node padding
    input_dim = 16
    hidden_1 = hidden_2 = hidden_3 = 64
    n_class = 8
    num_graphs = 4

    key = jax.random.PRNGKey(0)
    kx, ka, k1, k2, k3, k4 = jax.random.split(key, 6)

    x_in = jax.random.normal(kx, (N, input_dim), jnp.float32)
    adj = jax.random.uniform(ka, (N, N), jnp.float32)
    adj = adj / jnp.sum(adj, axis=1, keepdims=True)               # row-normalized
    idx = jnp.repeat(jnp.arange(num_graphs, dtype=jnp.int32), N // num_graphs)

    w1, b1 = _init_linear(k1, input_dim, hidden_1)
    w2, b2 = _init_linear(k2, hidden_1, hidden_2)
    w3, b3 = _init_linear(k3, hidden_2, hidden_3)
    w4, b4 = _init_linear(k4, hidden_3, n_class)
    params = (w1, b1, w2, b2, w3, b3, w4, b4)

    # 1) fused path: adj resident in VMEM, read from HBM once.
    out_fused = jax.block_until_ready(
        gnn_forward(x_in, adj, idx, params, num_graphs=num_graphs,
                    compute_dtype=jnp.bfloat16, fuse=True))
    # 2) tiled two-pass path with a (3, 3) grid (128-tiles, N padded 300 -> 384).
    out_tiled = jax.block_until_ready(
        gnn_forward(x_in, adj, idx, params, num_graphs=num_graphs,
                    tile=128, compute_dtype=jnp.bfloat16, fuse=False))
    # 3) full-f32 tiled path for a tighter numerical check of the same kernels.
    out_f32 = jax.block_until_ready(
        gnn_forward(x_in, adj, idx, params, num_graphs=num_graphs,
                    tile=128, compute_dtype=jnp.float32, fuse=False))

    # Pure-JAX f32 reference (highest matmul precision).
    hi = jax.lax.Precision.HIGHEST

    def ref(x_in, adj, idx):
        x = jax.nn.relu(jnp.dot(jnp.dot(adj, x_in, precision=hi), w1, precision=hi) + b1)
        x = jax.nn.relu(jnp.dot(jnp.dot(adj, x, precision=hi), w2, precision=hi) + b2)
        pooled = jax.ops.segment_sum(x, idx, num_segments=num_graphs)
        h = jax.nn.relu(jnp.dot(pooled, w3, precision=hi) + b3)
        logits = jnp.dot(h, w4, precision=hi) + b4
        return jax.nn.log_softmax(logits, axis=1)

    expected = ref(x_in, adj, idx)

    for name, out, tol in (("fused_bf16", out_fused, 5e-2),
                           ("tiled_bf16", out_tiled, 5e-2),
                           ("tiled_f32", out_f32, 1e-2)):
        assert out.shape == (num_graphs, n_class), (name, out.shape)
        assert jnp.allclose(out, expected, atol=tol, rtol=tol), f"{name} mismatch"

    print("KERNEL_OK")
</pallas_src>

<mosaic_0001>
module attributes {stable_mosaic.version = 11 : i64} {
  func.func @_fused_kernel(%arg0: memref<384x384xbf16, #tpu.memory_space<vmem>>, %arg1: memref<384x128xbf16, #tpu.memory_space<vmem>>, %arg2: memref<1x128xf32, #tpu.memory_space<vmem>>, %arg3: memref<128x128xbf16, #tpu.memory_space<vmem>>, %arg4: memref<1x128xf32, #tpu.memory_space<vmem>>, %arg5: memref<1x384xi32, #tpu.memory_space<vmem>>, %arg6: memref<128x64xf32, #tpu.memory_space<vmem>>, %arg7: memref<1x64xf32, #tpu.memory_space<vmem>>, %arg8: memref<64x8xf32, #tpu.memory_space<vmem>>, %arg9: memref<1x8xf32, #tpu.memory_space<vmem>>, %arg10: memref<8x8xf32, #tpu.memory_space<vmem>>) attributes {dimension_semantics = [], scalar_prefetch = 0 : i64, scratch_operands = 0 : i64, tpu.core_type = #tpu.core_type<tc>} {
    %c0 = arith.constant 0 : index
    %c0_0 = arith.constant 0 : index
    %0 = vector.load %arg0[%c0, %c0_0] : memref<384x384xbf16, #tpu.memory_space<vmem>>, vector<384x384xbf16>
    %c0_1 = arith.constant 0 : index
    %c0_2 = arith.constant 0 : index
    %1 = vector.load %arg1[%c0_1, %c0_2] : memref<384x128xbf16, #tpu.memory_space<vmem>>, vector<384x128xbf16>
    %cst = arith.constant dense<0.000000e+00> : vector<384x128xf32>
    %2 = tpu.matmul %0, %1, %cst {dimension_numbers = #tpu.dot_dimension_numbers<[1], [0], [0], [1], [0, 0, 1, 1], [], []>} : vector<384x384xbf16>, vector<384x128xbf16>, vector<384x128xf32> -> vector<384x128xf32>
    %c0_3 = arith.constant 0 : index
    %c0_4 = arith.constant 0 : index
    %3 = vector.load %arg2[%c0_3, %c0_4] : memref<1x128xf32, #tpu.memory_space<vmem>>, vector<1x128xf32>
    %4 = vector.broadcast %3 : vector<1x128xf32> to vector<384x128xf32>
    %5 = arith.addf %2, %4 : vector<384x128xf32>
    %cst_5 = arith.constant 0.000000e+00 : f32
    %6 = vector.broadcast %cst_5 : f32 to vector<384x128xf32>
    %7 = arith.maximumf %5, %6 : vector<384x128xf32>
    %8 = arith.truncf %7 : vector<384x128xf32> to vector<384x128xbf16>
    %c0_6 = arith.constant 0 : index
    %c0_7 = arith.constant 0 : index
    %9 = vector.load %arg3[%c0_6, %c0_7] : memref<128x128xbf16, #tpu.memory_space<vmem>>, vector<128x128xbf16>
    %cst_8 = arith.constant dense<0.000000e+00> : vector<384x128xf32>
    %10 = tpu.matmul %8, %9, %cst_8 {dimension_numbers = #tpu.dot_dimension_numbers<[1], [0], [0], [1], [0, 0, 1, 1], [], []>} : vector<384x128xbf16>, vector<128x128xbf16>, vector<384x128xf32> -> vector<384x128xf32>
    %11 = arith.truncf %10 : vector<384x128xf32> to vector<384x128xbf16>
    %cst_9 = arith.constant dense<0.000000e+00> : vector<384x128xf32>
    %12 = tpu.matmul %0, %11, %cst_9 {dimension_numbers = #tpu.dot_dimension_numbers<[1], [0], [0], [1], [0, 0, 1, 1], [], []>} : vector<384x384xbf16>, vector<384x128xbf16>, vector<384x128xf32> -> vector<384x128xf32>
    %c0_10 = arith.constant 0 : index
    %c0_11 = arith.constant 0 : index
    %13 = vector.load %arg4[%c0_10, %c0_11] : memref<1x128xf32, #tpu.memory_space<vmem>>, vector<1x128xf32>
    %14 = vector.broadcast %13 : vector<1x128xf32> to vector<384x128xf32>
    %15 = arith.addf %12, %14 : vector<384x128xf32>
    %cst_12 = arith.constant 0.000000e+00 : f32
    %16 = vector.broadcast %cst_12 : f32 to vector<384x128xf32>
    %17 = arith.maximumf %15, %16 : vector<384x128xf32>
    %c0_13 = arith.constant 0 : index
    %c0_14 = arith.constant 0 : index
    %18 = vector.load %arg5[%c0_13, %c0_14] : memref<1x384xi32, #tpu.memory_space<vmem>>, vector<1x384xi32>
    %19 = tpu.iota {dimensions = array<i32: 0>} : vector<8x384xi32>
    %20 = vector.broadcast %18 : vector<1x384xi32> to vector<8x384xi32>
    %21 = arith.cmpi eq, %19, %20 : vector<8x384xi32>
    %22 = arith.extui %21 : vector<8x384xi1> to vector<8x384xi32>
    %23 = arith.sitofp %22 : vector<8x384xi32> to vector<8x384xf32>
    %cst_15 = arith.constant dense<0.000000e+00> : vector<8x128xf32>
    %24 = tpu.matmul %23, %17, %cst_15 {dimension_numbers = #tpu.dot_dimension_numbers<[1], [0], [0], [1], [0, 0, 1, 1], [], []>} : vector<8x384xf32>, vector<384x128xf32>, vector<8x128xf32> -> vector<8x128xf32>
    %c0_16 = arith.constant 0 : index
    %c0_17 = arith.constant 0 : index
    %25 = vector.load %arg6[%c0_16, %c0_17] : memref<128x64xf32, #tpu.memory_space<vmem>>, vector<128x64xf32>
    %cst_18 = arith.constant dense<0.000000e+00> : vector<8x64xf32>
    %26 = tpu.matmul %24, %25, %cst_18 {dimension_numbers = #tpu.dot_dimension_numbers<[1], [0], [0], [1], [0, 0, 1, 1], [], []>} : vector<8x128xf32>, vector<128x64xf32>, vector<8x64xf32> -> vector<8x64xf32>
    %c0_19 = arith.constant 0 : index
    %c0_20 = arith.constant 0 : index
    %27 = vector.load %arg7[%c0_19, %c0_20] : memref<1x64xf32, #tpu.memory_space<vmem>>, vector<1x64xf32>
    %28 = vector.broadcast %27 : vector<1x64xf32> to vector<8x64xf32>
    %29 = arith.addf %26, %28 : vector<8x64xf32>
    %cst_21 = arith.constant 0.000000e+00 : f32
    %30 = vector.broadcast %cst_21 : f32 to vector<8x64xf32>
    %31 = arith.maximumf %29, %30 : vector<8x64xf32>
    %c0_22 = arith.constant 0 : index
    %c0_23 = arith.constant 0 : index
    %32 = vector.load %arg8[%c0_22, %c0_23] : memref<64x8xf32, #tpu.memory_space<vmem>>, vector<64x8xf32>
    %cst_24 = arith.constant dense<0.000000e+00> : vector<8x8xf32>
    %33 = tpu.matmul %31, %32, %cst_24 {dimension_numbers = #tpu.dot_dimension_numbers<[1], [0], [0], [1], [0, 0, 1, 1], [], []>} : vector<8x64xf32>, vector<64x8xf32>, vector<8x8xf32> -> vector<8x8xf32>
    %c0_25 = arith.constant 0 : index
    %c0_26 = arith.constant 0 : index
    %34 = vector.load %arg9[%c0_25, %c0_26] : memref<1x8xf32, #tpu.memory_space<vmem>>, vector<1x8xf32>
    %35 = vector.broadcast %34 : vector<1x8xf32> to vector<8x8xf32>
    %36 = arith.addf %33, %35 : vector<8x8xf32>
    %cst_27 = arith.constant dense<0xFF800000> : vector<8xf32>
    %37 = vector.multi_reduction <maximumf>, %36, %cst_27 [1] : vector<8x8xf32> to vector<8xf32>
    %38 = vector.shape_cast %37 : vector<8xf32> to vector<8x1xf32>
    %39 = vector.broadcast %38 : vector<8x1xf32> to vector<8x8xf32>
    %40 = arith.subf %36, %39 : vector<8x8xf32>
    %41 = math.exp %40 : vector<8x8xf32>
    %cst_28 = arith.constant dense<0.000000e+00> : vector<8xf32>
    %42 = vector.multi_reduction <add>, %41, %cst_28 [1] : vector<8x8xf32> to vector<8xf32>
    %43 = vector.shape_cast %42 : vector<8xf32> to vector<8x1xf32>
    %44 = math.log %43 : vector<8x1xf32>
    %45 = vector.broadcast %44 : vector<8x1xf32> to vector<8x8xf32>
    %46 = arith.subf %40, %45 : vector<8x8xf32>
    %c0_29 = arith.constant 0 : index
    %c0_30 = arith.constant 0 : index
    %47 = vector.load %arg10[%c0_29, %c0_30] : memref<8x8xf32, #tpu.memory_space<vmem>>, vector<8x8xf32>
    tpu.vector_store %arg10[%c0_29, %c0_30], %46 {strides = array<i32>} : memref<8x8xf32, #tpu.memory_space<vmem>>, vector<8x8xf32>,
    return
  }
}

</mosaic_0001>

<bundles_post_ra>
// kernel: gnn_forward.1
= control target key start
LH: loop header
LB: loop body
LE: loop exit
PB: predicated region body
PF: predicated region fallthrough
CT: control target
= control target key end

     0   :  { %v3197_v0 = vmov 0   ;;  %vm3200_vm3 = vmmov 0   ;;  %vm2328_vm4 = vcmask 523264   ;;  %vm2402_vm5 = vcmask 64512   ;;  %s4262_s1 = inlined_call_operand.vmem [shape: bf16[384,128], index: 1, kind: input, shape index: {}]   ;;  %s4263_s0 = inlined_call_operand.vmem [shape: bf16[384,384], index: 0, kind: input, shape index: {}]   ;;  %s4264_s3 = inlined_call_operand.vmem [shape: bf16[128,128], index: 3, kind: input, shape index: {}]   ;;  %s4265_s2 = inlined_call_operand.vmem [shape: f32[1,128], index: 2, kind: input, shape index: {}]   ;;  %s4266_s5 = inlined_call_operand.vmem [shape: s32[1,384], index: 5, kind: input, shape index: {}]   ;;  %s4267_s4 = inlined_call_operand.vmem [shape: f32[1,128], index: 4, kind: input, shape index: {}]   ;;  %s4268_s6 = inlined_call_operand.vmem [shape: f32[128,64], index: 6, kind: input, shape index: {}]   ;;  %s4269_s8 = inlined_call_operand.vmem [shape: f32[64,8], index: 8, kind: input, shape index: {}]   ;;  %s4270_s7 = inlined_call_operand.vmem [shape: f32[1,64], index: 7, kind: input, shape index: {}]   ;;  %s4271_s9 = inlined_call_operand.vmem [shape: f32[1,8], index: 9, kind: input, shape index: {}]   ;;  %s4272_s10 = inlined_call_operand.vmem [shape: f32[8,8], index: 10, kind: output, shape index: {}]  }
   0x1   :  { %715 = vmatprep.subr.bf16.mxu0 %v3197_v0  ;;  %v2994_v1 = vld [vmem:[%s4262_s1 + $0x38] sm:$0xff]   ;;  %v2995_v2 = vld [vmem:[%s4262_s1 + $0x30] sm:$0xff]   ;;  %v2996_v3 = vld [vmem:[%s4262_s1 + $0x28] sm:$0xff]  }
   0x2   :  { %716 = vmatpush1.bf16.msra.mxu0 %v2994_v1  ;;  %v3002_v4 = vld [vmem:[%s4262_s1 + $0xb8] sm:$0xff]   ;;  %v2997_v5 = vld [vmem:[%s4262_s1 + $0x20] sm:$0xff]   ;;  %v3004_v6 = vld [vmem:[%s4262_s1 + $0xb0] sm:$0xff]  }
   0x3   :  { %717 = vmatprep.subr.bf16.mxu0 %v3197_v0  ;;  %2709 = vmatprep.subr.bf16.mxu1 %v3002_v4  ;;  %v3006_v7 = vld [vmem:[%s4262_s1 + $0xa8] sm:$0xff]   ;;  %v2998_v8 = vld [vmem:[%s4262_s1 + $0x18] sm:$0xff]   ;;  %v3008_v9 = vld [vmem:[%s4262_s1 + $0xa0] sm:$0xff]  }
   0x4   :  { %2710 = vmatpush3.bf16.msra.mxu1 %v3002_v4  ;;  %v2999_v10 = vld [vmem:[%s4262_s1 + $0x10] sm:$0xff]   ;;  %v3010_v11 = vld [vmem:[%s4262_s1 + $0x98] sm:$0xff]   ;;  %v3000_v12 = vld [vmem:[%s4262_s1 + $0x8] sm:$0xff]  }
   0x5   :  { %2711 = vmatprep.subr.bf16.mxu1 %v3004_v6  ;;  %v3001_v13 = vld [vmem:[%s4262_s1] sm:$0xff]   ;;  %v3012_v14 = vld [vmem:[%s4262_s1 + $0x90] sm:$0xff]   ;;  %v3014_v17 = vld [vmem:[%s4262_s1 + $0x88] sm:$0xff]  }
   0x6   :  { %718 = vmatpush1.bf16.msra.mxu0 %v2995_v2  ;;  %v3020_v15 = vld [vmem:[%s4263_s0 + $0x4] ss:$12 sps:$4 sm:$0xff]   ;;  %v3311_v16 = vld [vmem:[%s4263_s0 + $0x8] ss:$12 sps:$4 sm:$0xff]   ;;  %v3003_v18 = vld [vmem:[%s4262_s1 + $0x78] sm:$0xff]  }
   0x7   :  { %719 = vmatprep.subr.bf16.mxu0 %v3197_v0  ;;  %747 = vmatprep.mubr.bf16.mxu0 %v3020_v15  ;;  %v3016_v19 = vld [vmem:[%s4262_s1 + $0x80] sm:$0xff]   ;;  %v3005_v20 = vld [vmem:[%s4262_s1 + $0x70] sm:$0xff]   ;;  %v3007_v21 = vld [vmem:[%s4262_s1 + $0x68] sm:$0xff]  }
   0x8   :  { %2712 = vmatpush3.bf16.msra.mxu1 %v3004_v6  ;;  %2725 = vmatprep.mubr.bf16.mxu1 %v3311_v16  ;;  %v3022_v22 = vld [vmem:[%s4263_s0 + $0x20] ss:$12 sps:$4 sm:$0xff]   ;;  %v3028_v23 = vld [vmem:[%s4263_s0 + $0x38] ss:$12 sps:$4 sm:$0xff]   ;;  %v3030_v26 = vld [vmem:[%s4263_s0 + $0x50] ss:$12 sps:$4 sm:$0xff]  }
   0x9   :  { %2713 = vmatprep.subr.bf16.mxu1 %v3006_v7  ;;  %v3009_v24 = vld [vmem:[%s4262_s1 + $0x60] sm:$0xff]   ;;  %v3011_v25 = vld [vmem:[%s4262_s1 + $0x58] sm:$0xff]   ;;  %v3036_v27 = vld [vmem:[%s4263_s0 + $0x68] ss:$12 sps:$4 sm:$0xff]  }
   0xa   :  { %720 = vmatpush1.bf16.msra.mxu0 %v2996_v3  ;;  %v3013_v28 = vld [vmem:[%s4262_s1 + $0x50] sm:$0xff]   ;;  %v3015_v29 = vld [vmem:[%s4262_s1 + $0x48] sm:$0xff]   ;;  %v3044_v31 = vld [vmem:[%s4263_s0 + $0x98] ss:$12 sps:$4 sm:$0xff]  }
   0xb   :  { %721 = vmatprep.subr.bf16.mxu0 %v3197_v0  ;;  %v3038_v30 = vld [vmem:[%s4263_s0 + $0x80] ss:$12 sps:$4 sm:$0xff]   ;;  %v3023_v34 = vld [vmem:[%s4263_s0 + $0x1c] ss:$12 sps:$4 sm:$0xff]   ;;  %v3025_v37 = vld [vmem:[%s4263_s0 + $0x18] ss:$12 sps:$4 sm:$0xff]  }
   0xc   :  { %2714 = vmatpush3.bf16.msra.mxu1 %v3006_v7  ;;  %v3017_v32 = vld [vmem:[%s4262_s1 + $0x40] sm:$0xff]   ;;  %v3046_v35 = vld [vmem:[%s4263_s0 + $0xb0] ss:$12 sps:$4 sm:$0xff]   ;;  %v3052_v36 = vld [vmem:[%s4263_s0 + $0xc8] ss:$12 sps:$4 sm:$0xff]  }
   0xd   :  { %2715 = vmatprep.subr.bf16.mxu1 %v3008_v9  ;;  %v3018_v33 = vld [vmem:[%s4263_s0] ss:$12 sps:$4 sm:$0xff]   ;;  %v3060_v40 = vld [vmem:[%s4263_s0 + $0xf8] ss:$12 sps:$4 sm:$0xff]   ;;  %v3029_v41 = vld [vmem:[%s4263_s0 + $0x30] ss:$12 sps:$4 sm:$0xff]  }
   0xe   :  { %722 = vmatpush1.bf16.msra.mxu0 %v2997_v5  ;;  %v3026_v38 = vld [vmem:[%s4263_s0 + $0x34] ss:$12 sps:$4 sm:$0xff]   ;;  %v3031_v42 = vld [vmem:[%s4263_s0 + $0x4c] ss:$12 sps:$4 sm:$0xff]   ;;  %v3062_v43 = vld [vmem:[%s4263_s0 + $0x110] ss:$12 sps:$4 sm:$0xff]  }
   0xf   :  { %723 = vmatprep.subr.bf16.mxu0 %v3197_v0  ;;  %v3054_v39 = vld [vmem:[%s4263_s0 + $0xe0] ss:$12 sps:$4 sm:$0xff]   ;;  %v3068_v44 = vld [vmem:[%s4263_s0 + $0x128] ss:$12 sps:$4 sm:$0xff]   ;;  %v3034_v46 = vld [vmem:[%s4263_s0 + $0x64] ss:$12 sps:$4 sm:$0xff]  }
  0x10   :  { %2716 = vmatpush3.bf16.msra.mxu1 %v3008_v9  ;;  %v3033_v45 = vld [vmem:[%s4263_s0 + $0x48] ss:$12 sps:$4 sm:$0xff]   ;;  %v3070_v47 = vld [vmem:[%s4263_s0 + $0x140] ss:$12 sps:$4 sm:$0xff]   ;;  %v3076_v48 = vld [vmem:[%s4263_s0 + $0x158] ss:$12 sps:$4 sm:$0xff]  }
  0x11   :  { %2717 = vmatprep.subr.bf16.mxu1 %v3010_v11  ;;  %v3037_v49 = vld [vmem:[%s4263_s0 + $0x60] ss:$12 sps:$4 sm:$0xff]   ;;  %v3039_v50 = vld [vmem:[%s4263_s0 + $0x7c] ss:$12 sps:$4 sm:$0xff]   ;;  %v3041_v53 = vld [vmem:[%s4263_s0 + $0x78] ss:$12 sps:$4 sm:$0xff]  }
  0x12   :  { %724 = vmatpush1.bf16.msra.mxu0 %v2998_v8  ;;  %v3078_v51 = vld [vmem:[%s4263_s0 + $0x170] ss:$12 sps:$4 sm:$0xff]   ;;  %v3084_v52 = vld [vmem:[%s4263_s0 + $0x188] ss:$12 sps:$4 sm:$0xff]   ;;  %v3086_v55 = vld [vmem:[%s4263_s0 + $0x1a0] ss:$12 sps:$4 sm:$0xff]  }
  0x13   :  { %725 = vmatprep.subr.bf16.mxu0 %v3197_v0  ;;  %v3042_v54 = vld [vmem:[%s4263_s0 + $0x94] ss:$12 sps:$4 sm:$0xff]   ;;  %v3092_v56 = vld [vmem:[%s4263_s0 + $0x1b8] ss:$12 sps:$4 sm:$0xff]   ;;  %v3045_v57 = vld [vmem:[%s4263_s0 + $0x90] ss:$12 sps:$4 sm:$0xff]  }
  0x14   :  { %2718 = vmatpush3.bf16.msra.mxu1 %v3010_v11  ;;  %v3047_v58 = vld [vmem:[%s4263_s0 + $0xac] ss:$12 sps:$4 sm:$0xff]   ;;  %v3094_v59 = vld [vmem:[%s4263_s0 + $0x1d0] ss:$12 sps:$4 sm:$0xff]   ;;  %v3100_v60 = vld [vmem:[%s4263_s0 + $0x1e8] ss:$12 sps:$4 sm:$0xff]  }
  0x15   :  { %2719 = vmatprep.subr.bf16.mxu1 %v3012_v14  ;;  %v3111_v61 = vld [vmem:[%s4264_s3 + $0x38] sm:$0xff]   ;;  %v3049_v62 = vld [vmem:[%s4263_s0 + $0xa8] ss:$12 sps:$4 sm:$0xff]   ;;  %v3050_v63 = vld [vmem:[%s4263_s0 + $0xc4] ss:$12 sps:$4 sm:$0xff]  }
  0x16   :  { %726 = vmatpush1.bf16.msra.mxu0 %v2999_v10  ;;  %v3102_v1 = vld [vmem:[%s4263_s0 + $0x200] ss:$12 sps:$4 sm:$0xff]   ;;  %v3108_v2 = vld [vmem:[%s4263_s0 + $0x218] ss:$12 sps:$4 sm:$0xff]   ;;  %v3115_v3 = vld [vmem:[%s4264_s3 + $0x30] sm:$0xff]  }
  0x17   :  { %727 = vmatprep.subr.bf16.mxu0 %v3197_v0  ;;  %v3116_v4 = vld [vmem:[%s4264_s3 + $0x28] sm:$0xff]   ;;  %v3110_v7 = vld [vmem:[%s4263_s0 + $0x230] ss:$12 sps:$4 sm:$0xff]   ;;  %v3117_v8 = vld [vmem:[%s4264_s3 + $0x20] sm:$0xff]  }
  0x18   :  { %2720 = vmatpush3.bf16.msra.mxu1 %v3012_v14  ;;  %v3053_v5 = vld [vmem:[%s4263_s0 + $0xc0] ss:$12 sps:$4 sm:$0xff]   ;;  %v3055_v6 = vld [vmem:[%s4263_s0 + $0xdc] ss:$12 sps:$4 sm:$0xff]   ;;  %v3057_v10 = vld [vmem:[%s4263_s0 + $0xd8] ss:$12 sps:$4 sm:$0xff]  }
  0x19   :  { %2721 = vmatprep.subr.bf16.mxu1 %v3014_v17  ;;  %v3118_v9 = vld [vmem:[%s4264_s3 + $0x18] sm:$0xff]   ;;  %v3058_v11 = vld [vmem:[%s4263_s0 + $0xf4] ss:$12 sps:$4 sm:$0xff]  }
  0x1a   :  { %728 = vmatpush1.bf16.msra.mxu0 %v3000_v12  ;;  %v3119_v12 = vld [vmem:[%s4264_s3 + $0x10] sm:$0xff]   ;;  %v3063_v15 = vld [vmem:[%s4263_s0 + $0x10c] ss:$12 sps:$4 sm:$0xff]  }
  0x1b   :  { %729 = vmatprep.subr.bf16.mxu0 %v3197_v0  ;;  %v3061_v14 = vld [vmem:[%s4263_s0 + $0xf0] ss:$12 sps:$4 sm:$0xff]  }
  0x1c   :  { %2722 = vmatpush3.bf16.msra.mxu1 %v3014_v17  ;;  %v3121_v17 = vld [vmem:[%s4264_s3] sm:$0xff]  }
  0x1d   :  { %2723 = vmatprep.subr.bf16.mxu1 %v3016_v19 }
  0x1e   :  { %730 = vmatpush1.bf16.msra.mxu0 %v3001_v13  ;;  %v3120_v13 = vld [vmem:[%s4264_s3 + $0x8] sm:$0xff]  }
  0x1f   :  { %731 = vmatprep.subr.bf16.mxu0 %v3197_v0 }
  0x20   :  { %2724 = vmatpush3.bf16.msra.mxu1 %v3016_v19  ;;  %v3066_v19 = vld [vmem:[%s4263_s0 + $0x124] ss:$12 sps:$4 sm:$0xff]  }
  0x21   :  { %2773 = vmatprep.subr.bf16.mxu1 %v3111_v61 }
  0x22   :  { %732 = vmatpush2.bf16.msra.mxu0 %v3003_v18  ;;  %v3065_v18 = vld [vmem:[%s4263_s0 + $0x108] ss:$12 sps:$4 sm:$0xff]  }
  0x23   :  { %733 = vmatprep.subr.bf16.mxu0 %v3197_v0  ;;  %2726 = vmatmul.mubr.bf16.vlgmr.msra.gmra.mxu1 %v3022_v22  ;;  %v3073_v22 = vld [vmem:[%s4263_s0 + $0x138] ss:$12 sps:$4 sm:$0xff]  }
  0x24   :  { %2729 = vmatprep.mubr.bf16.mxu1 %v3028_v23  ;;  %2774 = vmatpush3.bf16.msra.mxu1 %v3111_v61  ;;  %v3074_v23 = vld [vmem:[%s4263_s0 + $0x154] ss:$12 sps:$4 sm:$0xff]  }
  0x25   :  { %2775 = vmatprep.subr.bf16.mxu1 %v3115_v3 }
  0x26   :  { %734 = vmatpush2.bf16.msra.mxu0 %v3005_v20  ;;  %v3069_v20 = vld [vmem:[%s4263_s0 + $0x120] ss:$12 sps:$4 sm:$0xff]  }
  0x27   :  { %735 = vmatprep.subr.bf16.mxu0 %v3197_v0 }
  0x28   :  { %2776 = vmatpush3.bf16.msra.mxu1 %v3115_v3 }
  0x29   :  { %2777 = vmatprep.subr.bf16.mxu1 %v3116_v4 }
  0x2a   :  { %736 = vmatpush2.bf16.msra.mxu0 %v3007_v21  ;;  %v3071_v21 = vld [vmem:[%s4263_s0 + $0x13c] ss:$12 sps:$4 sm:$0xff]  }
  0x2b   :  { %737 = vmatprep.subr.bf16.mxu0 %v3197_v0  ;;  %2730 = vmatmul.mubr.bf16.gmra.mxu1 %v3030_v26  ;;  %v3081_v26 = vld [vmem:[%s4263_s0 + $0x168] ss:$12 sps:$4 sm:$0xff]  }
  0x2c   :  { %2733 = vmatprep.mubr.bf16.mxu1 %v3036_v27  ;;  %2778 = vmatpush3.bf16.msra.mxu1 %v3116_v4  ;;  %v3082_v27 = vld [vmem:[%s4263_s0 + $0x184] ss:$12 sps:$4 sm:$0xff]  }
  0x2d   :  { %2779 = vmatprep.subr.bf16.mxu1 %v3117_v8 }
  0x2e   :  { %738 = vmatpush2.bf16.msra.mxu0 %v3009_v24  ;;  %v3077_v24 = vld [vmem:[%s4263_s0 + $0x150] ss:$12 sps:$4 sm:$0xff]  }
  0x2f   :  { %739 = vmatprep.subr.bf16.mxu0 %v3197_v0 }
  0x30   :  { %2780 = vmatpush3.bf16.msra.mxu1 %v3117_v8 }
  0x31   :  { %2781 = vmatprep.subr.bf16.mxu1 %v3118_v9 }
  0x32   :  { %740 = vmatpush2.bf16.msra.mxu0 %v3011_v25  ;;  %v3079_v25 = vld [vmem:[%s4263_s0 + $0x16c] ss:$12 sps:$4 sm:$0xff]  }
  0x33   :  { %741 = vmatprep.subr.bf16.mxu0 %v3197_v0  ;;  %2734 = vmatmul.mubr.bf16.gmra.mxu1 %v3038_v30  ;;  %v3089_v30 = vld [vmem:[%s4263_s0 + $0x198] ss:$12 sps:$4 sm:$0xff]  }
  0x34   :  { %2737 = vmatprep.mubr.bf16.mxu1 %v3044_v31  ;;  %2782 = vmatpush3.bf16.msra.mxu1 %v3118_v9  ;;  %v3090_v31 = vld [vmem:[%s4263_s0 + $0x1b4] ss:$12 sps:$4 sm:$0xff]  }
  0x35   :  { %2783 = vmatprep.subr.bf16.mxu1 %v3119_v12 }
  0x36   :  { %742 = vmatpush2.bf16.msra.mxu0 %v3013_v28  ;;  %v3085_v28 = vld [vmem:[%s4263_s0 + $0x180] ss:$12 sps:$4 sm:$0xff]  }
  0x37   :  { %743 = vmatprep.subr.bf16.mxu0 %v3197_v0 }
  0x38   :  { %2784 = vmatpush3.bf16.msra.mxu1 %v3119_v12 }
  0x39   :  { %2785 = vmatprep.subr.bf16.mxu1 %v3120_v13 }
  0x3a   :  { %744 = vmatpush2.bf16.msra.mxu0 %v3015_v29  ;;  %v3087_v29 = vld [vmem:[%s4263_s0 + $0x19c] ss:$12 sps:$4 sm:$0xff]  }
  0x3b   :  { %745 = vmatprep.subr.bf16.mxu0 %v3197_v0  ;;  %2738 = vmatmul.mubr.bf16.gmra.mxu1 %v3046_v35  ;;  %v3098_v35 = vld [vmem:[%s4263_s0 + $0x1e4] ss:$12 sps:$4 sm:$0xff]  }
  0x3c   :  { %2741 = vmatprep.mubr.bf16.mxu1 %v3052_v36  ;;  %2786 = vmatpush3.bf16.msra.mxu1 %v3120_v13  ;;  %v3101_v36 = vld [vmem:[%s4263_s0 + $0x1e0] ss:$12 sps:$4 sm:$0xff]  }
  0x3d   :  { %2787 = vmatprep.subr.bf16.mxu1 %v3121_v17 }
  0x3e   :  { %746 = vmatpush2.bf16.msra.mxu0 %v3017_v32  ;;  %v3093_v32 = vld [vmem:[%s4263_s0 + $0x1b0] ss:$12 sps:$4 sm:$0xff]  }
  0x40   :  { %2788 = vmatpush3.bf16.msra.mxu1 %v3121_v17 }
  0x41   :  { %748 = vmatmul.mubr.bf16.vlgmr.msra.gmra.mxu0 %v3018_v33  ;;  %1557 = vmatprep.subr.bf16.mxu1 %v3197_v0  ;;  %v3095_v33 = vld [vmem:[%s4263_s0 + $0x1cc] ss:$12 sps:$4 sm:$0xff]  }
  0x42   :  { %755 = vmatprep.mubr.bf16.mxu0 %v3023_v34  ;;  %v3097_v34 = vld [vmem:[%s4263_s0 + $0x1c8] ss:$12 sps:$4 sm:$0xff]  }
  0x43   :  { %2742 = vmatmul.mubr.bf16.gmra.mxu1 %v3054_v39  ;;  %v3106_v39 = vld [vmem:[%s4263_s0 + $0x214] ss:$12 sps:$4 sm:$0xff]  }
  0x44   :  { %2745 = vmatprep.mubr.bf16.mxu1 %v3060_v40  ;;  %v3109_v40 = vld [vmem:[%s4263_s0 + $0x210] ss:$12 sps:$4 sm:$0xff]  }
  0x49   :  { %756 = vmatmul.mubr.bf16.gmra.mxu0 %v3025_v37  ;;  %v3103_v37 = vld [vmem:[%s4263_s0 + $0x1fc] ss:$12 sps:$4 sm:$0xff]  }
  0x4a   :  { %763 = vmatprep.mubr.bf16.mxu0 %v3026_v38  ;;  %v3105_v38 = vld [vmem:[%s4263_s0 + $0x1f8] ss:$12 sps:$4 sm:$0xff]  }
  0x4b   :  { %2746 = vmatmul.mubr.bf16.gmra.mxu1 %v3062_v43 }
  0x4c   :  { %2749 = vmatprep.mubr.bf16.mxu1 %v3068_v44 }
  0x51   :  { %764 = vmatmul.mubr.bf16.gmra.mxu0 %v3029_v41  ;;  %v3112_v41 = vld [vmem:[%s4263_s0 + $0x22c] ss:$12 sps:$4 sm:$0xff]  }
  0x52   :  { %771 = vmatprep.mubr.bf16.mxu0 %v3031_v42  ;;  %v3114_v42 = vld [vmem:[%s4263_s0 + $0x228] ss:$12 sps:$4 sm:$0xff]  }
  0x53   :  { %2750 = vmatmul.mubr.bf16.gmra.mxu1 %v3070_v47 }
  0x54   :  { %2753 = vmatprep.mubr.bf16.mxu1 %v3076_v48 }
  0x59   :  { %772 = vmatmul.mubr.bf16.gmra.mxu0 %v3033_v45  ;;  %v3592_v45 = vld [vmem:[%s4265_s2] ss:$0 sm:$0xff] }
  0x5a   :  { %779 = vmatprep.mubr.bf16.mxu0 %v3034_v46 }
  0x5b   :  { %2754 = vmatmul.mubr.bf16.gmra.mxu1 %v3078_v51 }
  0x5c   :  { %2757 = vmatprep.mubr.bf16.mxu1 %v3084_v52 }
  0x61   :  { %780 = vmatmul.mubr.bf16.gmra.mxu0 %v3037_v49 }
  0x62   :  { %787 = vmatprep.mubr.bf16.mxu0 %v3039_v50 }
  0x63   :  { %2758 = vmatmul.mubr.bf16.gmra.mxu1 %v3086_v55 }
  0x64   :  { %2761 = vmatprep.mubr.bf16.mxu1 %v3092_v56 }
  0x69   :  { %788 = vmatmul.mubr.bf16.gmra.mxu0 %v3041_v53 }
  0x6a   :  { %795 = vmatprep.mubr.bf16.mxu0 %v3042_v54 }
  0x6b   :  { %2762 = vmatmul.mubr.bf16.gmra.mxu1 %v3094_v59 }
  0x6c   :  { %2765 = vmatprep.mubr.bf16.mxu1 %v3100_v60 }
  0x71   :  { %796 = vmatmul.mubr.bf16.gmra.mxu0 %v3045_v57 }
  0x72   :  { %803 = vmatprep.mubr.bf16.mxu0 %v3047_v58 }
  0x73   :  { %2766 = vmatmul.mubr.bf16.gmra.mxu1 %v3102_v1 }
  0x74   :  { %2769 = vmatprep.mubr.bf16.mxu1 %v3108_v2 }
  0x79   :  { %804 = vmatmul.mubr.bf16.gmra.mxu0 %v3049_v62 }
  0x7a   :  { %811 = vmatprep.mubr.bf16.mxu0 %v3050_v63 }
  0x7b   :  { %2770 = vmatmul.mubr.bf16.gmra.mxu1 %v3110_v7 }
  0x81   :  { %812 = vmatmul.mubr.bf16.gmra.mxu0 %v3053_v5 }
  0x82   :  { %819 = vmatprep.mubr.bf16.mxu0 %v3055_v6 }
  0x89   :  { %820 = vmatmul.mubr.bf16.gmra.mxu0 %v3057_v10 }
  0x8a   :  { %827 = vmatprep.mubr.bf16.mxu0 %v3058_v11 }
  0x91   :  { %828 = vmatmul.mubr.bf16.gmra.mxu0 %v3061_v14 }
  0x92   :  { %835 = vmatprep.mubr.bf16.mxu0 %v3063_v15 }
  0x99   :  { %836 = vmatmul.mubr.bf16.gmra.mxu0 %v3065_v18 }
  0x9a   :  { %843 = vmatprep.mubr.bf16.mxu0 %v3066_v19 }
  0xa1   :  { %844 = vmatmul.mubr.bf16.gmra.mxu0 %v3069_v20 }
  0xa2   :  { %851 = vmatprep.mubr.bf16.mxu0 %v3071_v21 }
  0xa9   :  { %852 = vmatmul.mubr.bf16.gmra.mxu0 %v3073_v22 }
  0xaa   :  { %859 = vmatprep.mubr.bf16.mxu0 %v3074_v23 }
  0xb1   :  { %860 = vmatmul.mubr.bf16.gmra.mxu0 %v3077_v24 }
  0xb2   :  { %867 = vmatprep.mubr.bf16.mxu0 %v3079_v25 }
  0xb9   :  { %868 = vmatmul.mubr.bf16.gmra.mxu0 %v3081_v26 }
  0xba   :  { %875 = vmatprep.mubr.bf16.mxu0 %v3082_v27 }
  0xc1   :  { %876 = vmatmul.mubr.bf16.gmra.mxu0 %v3085_v28 }
  0xc2   :  { %883 = vmatprep.mubr.bf16.mxu0 %v3087_v29 }
  0xc9   :  { %884 = vmatmul.mubr.bf16.gmra.mxu0 %v3089_v30 }
  0xca   :  { %891 = vmatprep.mubr.bf16.mxu0 %v3090_v31 }
  0xd1   :  { %892 = vmatmul.mubr.bf16.gmra.mxu0 %v3093_v32 }
  0xd2   :  { %899 = vmatprep.mubr.bf16.mxu0 %v3095_v33 }
  0xd9   :  { %900 = vmatmul.mubr.bf16.gmra.mxu0 %v3097_v34 }
  0xda   :  { %907 = vmatprep.mubr.bf16.mxu0 %v3098_v35 }
  0xe1   :  { %908 = vmatmul.mubr.bf16.gmra.mxu0 %v3101_v36 }
  0xe2   :  { %915 = vmatprep.mubr.bf16.mxu0 %v3103_v37 }
  0xe3   :  { %v2727_v43 = vpop.f32.mrf.mxu1 }
  0xe5   :  { %v974_v44 = vpop.f32.mrf.mxu1 }
  0xe7   :  { %v2728_v47 = vpop.f32.mrf.mxu1 }
  0xe9   :  { %916 = vmatmul.mubr.bf16.gmra.mxu0 %v3105_v38  ;;  %v977_v51 = vpop.f32.mrf.mxu1 }
  0xea   :  { %923 = vmatprep.mubr.bf16.mxu0 %v3106_v39 }
  0xf1   :  { %924 = vmatmul.mubr.bf16.gmra.mxu0 %v3109_v40 }
  0xf2   :  { %931 = vmatprep.mubr.bf16.mxu0 %v3112_v41 }
  0xf9   :  { %932 = vmatmul.mubr.bf16.gmra.mxu0 %v3114_v42 }
  0xfa   :  { %2853 = vmatprep.mubr.bf16.mxu0 %v3311_v16  ;;  %v2731_v16 = vpop.f32.mrf.mxu1 }
  0xfc   :  { %v990_v63 = vpop.f32.mrf.mxu1 }
  0xfe   :  { %v2732_v6 = vpop.f32.mrf.mxu1 }
 0x100   :  { %v993_v13 = vpop.f32.mrf.mxu1 }
 0x101   :  { %v749_v46 = vpop.f32.mrf.mxu0 }
 0x102   :  { %v750_v48 = vadd.f32 %v3592_v45, %v749_v46  ;;  %v2735_v20 = vpop.f32.mrf.mxu1 }
 0x103   :  { %v751_v49 = vpop.f32.mrf.mxu0 }
 0x104   :  { %v975_v52 = vadd.f32 %v974_v44, %v750_v48  ;;  %v1006_v27 = vpop.f32.mrf.mxu1 }
 0x105   :  { %v752_v50 = vpop.f32.mrf.mxu0 }
 0x106   :  { %v753_v53 = vadd.f32 %v3592_v45, %v752_v50  ;;  %v1165_v57 = vmax.f32 %v975_v52, 0.0  ;;  %v2736_v33 = vpop.f32.mrf.mxu1 }
 0x107   :  { %v754_v54 = vpop.f32.mrf.mxu0 }
 0x108   :  { %v978_v55 = vadd.f32 %v977_v51, %v753_v53  ;;  %v1009_v40 = vpop.f32.mrf.mxu1 }
 0x109   :  { %v757_v56 = vpop.f32.mrf.mxu0 }
 0x10a   :  { %v1166_v58 = vmax.f32 %v978_v55, 0.0  ;;  %v758_v59 = vadd.f32 %v3592_v45, %v757_v56 }
 0x10b   :  { %v759_v60 = vpop.f32.mrf.mxu0 }
 0x10c   :  { %v1213_v61 = vpack.c.bf16 %v1166_v58, %v1165_v57  ;;  %v983_v1 = vadd.f32 %v2727_v43, %v758_v59 }
 0x10d   :  { %v760_v62 = vpop.f32.mrf.mxu0 }
 0x10e   :  { %v761_v2 = vadd.f32 %v3592_v45, %v760_v62  ;;  %2789 = vmatprep.mubr.bf16.mxu1 %v1213_v61  ;;  %v1167_v7 = vmax.f32 %v983_v1, 0.0 }
 0x10f   :  { %v762_v3 = vpop.f32.mrf.mxu0 }
 0x110   :  { %v986_v4 = vadd.f32 %v2728_v47, %v761_v2  ;;  %v2739_v47 = vpop.f32.mrf.mxu1 }
 0x111   :  { %v765_v5 = vpop.f32.mrf.mxu0 }
 0x112   :  { %v1168_v8 = vmax.f32 %v986_v4, 0.0  ;;  %v766_v9 = vadd.f32 %v3592_v45, %v765_v5  ;;  %v1022_v54 = vpop.f32.mrf.mxu1 }
 0x113   :  { %v767_v10 = vpop.f32.mrf.mxu0 }
 0x114   :  { %v1214_v11 = vpack.c.bf16 %v1168_v8, %v1167_v7  ;;  %v991_v14 = vadd.f32 %v990_v63, %v766_v9  ;;  %v2740_v59 = vpop.f32.mrf.mxu1 }
 0x115   :  { %v768_v12 = vpop.f32.mrf.mxu0 }
 0x116   :  { %v769_v15 = vadd.f32 %v3592_v45, %v768_v12  ;;  %2790 = vmatmul.mubr.bf16.vlgmr.msra.gmra.mxu1 %v1214_v11  ;;  %v1169_v21 = vmax.f32 %v991_v14, 0.0  ;;  %v1025_v3 = vpop.f32.mrf.mxu1 }
 0x117   :  { %v770_v17 = vpop.f32.mrf.mxu0 }
 0x118   :  { %v994_v18 = vadd.f32 %v993_v13, %v769_v15  ;;  %v2743_v9 = vpop.f32.mrf.mxu1 }
 0x119   :  { %v773_v19 = vpop.f32.mrf.mxu0 }
 0x11a   :  { %v1170_v22 = vmax.f32 %v994_v18, 0.0  ;;  %v774_v23 = vadd.f32 %v3592_v45, %v773_v19  ;;  %v1038_v17 = vpop.f32.mrf.mxu1 }
 0x11b   :  { %v775_v24 = vpop.f32.mrf.mxu0 }
 0x11c   :  { %v1215_v25 = vpack.c.bf16 %v1170_v22, %v1169_v21  ;;  %v999_v28 = vadd.f32 %v2731_v16, %v774_v23  ;;  %v2744_v23 = vpop.f32.mrf.mxu1 }
 0x11d   :  { %v776_v26 = vpop.f32.mrf.mxu0 }
 0x11e   :  { %v777_v29 = vadd.f32 %v3592_v45, %v776_v26  ;;  %2793 = vmatprep.mubr.bf16.mxu1 %v1215_v25  ;;  %v1171_v34 = vmax.f32 %v999_v28, 0.0 }
 0x11f   :  { %v778_v30 = vpop.f32.mrf.mxu0 }
 0x120   :  { %v1002_v31 = vadd.f32 %v2732_v6, %v777_v29  ;;  %v1041_v30 = vpop.f32.mrf.mxu1 }
 0x121   :  { %v781_v32 = vpop.f32.mrf.mxu0 }
 0x122   :  { %v1172_v35 = vmax.f32 %v1002_v31, 0.0  ;;  %v782_v36 = vadd.f32 %v3592_v45, %v781_v32 }
 0x123   :  { %v783_v37 = vpop.f32.mrf.mxu0 }
 0x124   :  { %v1216_v38 = vpack.c.bf16 %v1172_v35, %v1171_v34  ;;  %v1007_v41 = vadd.f32 %v1006_v27, %v782_v36  ;;  %v2747_v36 = vpop.f32.mrf.mxu1 }
 0x125   :  { %v784_v39 = vpop.f32.mrf.mxu0 }
 0x126   :  { %v785_v42 = vadd.f32 %v3592_v45, %v784_v39  ;;  %2794 = vmatmul.mubr.bf16.gmra.mxu1 %v1216_v38  ;;  %v1173_v48 = vmax.f32 %v1007_v41, 0.0 }
 0x127   :  { %v786_v43 = vpop.f32.mrf.mxu0 }
 0x128   :  { %v1010_v44 = vadd.f32 %v1009_v40, %v785_v42  ;;  %v1054_v43 = vpop.f32.mrf.mxu1 }
 0x129   :  { %v789_v46 = vpop.f32.mrf.mxu0 }
 0x12a   :  { %v1174_v49 = vmax.f32 %v1010_v44, 0.0  ;;  %v790_v50 = vadd.f32 %v3592_v45, %v789_v46 }
 0x12b   :  { %v791_v51 = vpop.f32.mrf.mxu0 }
 0x12c   :  { %v1217_v52 = vpack.c.bf16 %v1174_v49, %v1173_v48  ;;  %v1015_v55 = vadd.f32 %v2735_v20, %v790_v50  ;;  %v2748_v50 = vpop.f32.mrf.mxu1 }
 0x12d   :  { %v792_v53 = vpop.f32.mrf.mxu0 }
 0x12e   :  { %v793_v56 = vadd.f32 %v3592_v45, %v792_v53  ;;  %2797 = vmatprep.mubr.bf16.mxu1 %v1217_v52  ;;  %v1175_v60 = vmax.f32 %v1015_v55, 0.0 }
 0x12f   :  { %v794_v16 = vpop.f32.mrf.mxu0 }
 0x130   :  { %v1018_v57 = vadd.f32 %v2736_v33, %v793_v56  ;;  %v1057_v16 = vpop.f32.mrf.mxu1 }
 0x131   :  { %v797_v58 = vpop.f32.mrf.mxu0 }
 0x132   :  { %v1176_v61 = vmax.f32 %v1018_v57, 0.0  ;;  %v798_v62 = vadd.f32 %v3592_v45, %v797_v58 }
 0x133   :  { %v799_v63 = vpop.f32.mrf.mxu0 }
 0x134   :  { %v1218_v1 = vpack.c.bf16 %v1176_v61, %v1175_v60  ;;  %v1023_v4 = vadd.f32 %v1022_v54, %v798_v62  ;;  %v2751_v62 = vpop.f32.mrf.mxu1 }
 0x135   :  { %v800_v2 = vpop.f32.mrf.mxu0 }
 0x136   :  { %v801_v5 = vadd.f32 %v3592_v45, %v800_v2  ;;  %2798 = vmatmul.mubr.bf16.gmra.mxu1 %v1218_v1  ;;  %v1177_v10 = vmax.f32 %v1023_v4, 0.0 }
 0x137   :  { %v802_v6 = vpop.f32.mrf.mxu0 }
 0x138   :  { %v1026_v7 = vadd.f32 %v1025_v3, %v801_v5  ;;  %v1070_v6 = vpop.f32.mrf.mxu1 }
 0x139   :  { %v805_v8 = vpop.f32.mrf.mxu0 }
 0x13a   :  { %v1178_v11 = vmax.f32 %v1026_v7, 0.0  ;;  %v806_v12 = vadd.f32 %v3592_v45, %v805_v8 }
 0x13b   :  { %v807_v13 = vpop.f32.mrf.mxu0 }
 0x13c   :  { %v1219_v14 = vpack.c.bf16 %v1178_v11, %v1177_v10  ;;  %v1031_v18 = vadd.f32 %v2739_v47, %v806_v12  ;;  %v2752_v12 = vpop.f32.mrf.mxu1 }
 0x13d   :  { %v808_v15 = vpop.f32.mrf.mxu0 }
 0x13e   :  { %v809_v19 = vadd.f32 %v3592_v45, %v808_v15  ;;  %2801 = vmatprep.mubr.bf16.mxu1 %v1219_v14  ;;  %v1179_v24 = vmax.f32 %v1031_v18, 0.0 }
 0x13f   :  { %v810_v20 = vpop.f32.mrf.mxu0 }
 0x140   :  { %v1034_v21 = vadd.f32 %v2740_v59, %v809_v19  ;;  %v1073_v20 = vpop.f32.mrf.mxu1 }
 0x141   :  { %v813_v22 = vpop.f32.mrf.mxu0 }
 0x142   :  { %v1180_v25 = vmax.f32 %v1034_v21, 0.0  ;;  %v814_v26 = vadd.f32 %v3592_v45, %v813_v22 }
 0x143   :  { %v815_v27 = vpop.f32.mrf.mxu0 }
 0x144   :  { %v1220_v28 = vpack.c.bf16 %v1180_v25, %v1179_v24  ;;  %v1039_v31 = vadd.f32 %v1038_v17, %v814_v26  ;;  %v2755_v26 = vpop.f32.mrf.mxu1 }
 0x145   :  { %v816_v29 = vpop.f32.mrf.mxu0 }
 0x146   :  { %v817_v32 = vadd.f32 %v3592_v45, %v816_v29  ;;  %2802 = vmatmul.mubr.bf16.gmra.mxu1 %v1220_v28  ;;  %v1181_v37 = vmax.f32 %v1039_v31, 0.0 }
 0x147   :  { %v818_v33 = vpop.f32.mrf.mxu0 }
 0x148   :  { %v1042_v34 = vadd.f32 %v1041_v30, %v817_v32  ;;  %v1086_v33 = vpop.f32.mrf.mxu1 }
 0x149   :  { %v821_v35 = vpop.f32.mrf.mxu0 }
 0x14a   :  { %v1182_v38 = vmax.f32 %v1042_v34, 0.0  ;;  %v822_v39 = vadd.f32 %v3592_v45, %v821_v35 }
 0x14b   :  { %v823_v40 = vpop.f32.mrf.mxu0 }
 0x14c   :  { %v1221_v41 = vpack.c.bf16 %v1182_v38, %v1181_v37  ;;  %v1047_v44 = vadd.f32 %v2743_v9, %v822_v39  ;;  %v2756_v39 = vpop.f32.mrf.mxu1 }
 0x14d   :  { %v824_v42 = vpop.f32.mrf.mxu0 }
 0x14e   :  { %v825_v46 = vadd.f32 %v3592_v45, %v824_v42  ;;  %2805 = vmatprep.mubr.bf16.mxu1 %v1221_v41  ;;  %v1183_v51 = vmax.f32 %v1047_v44, 0.0 }
 0x14f   :  { %v826_v47 = vpop.f32.mrf.mxu0 }
 0x150   :  { %v1050_v48 = vadd.f32 %v2744_v23, %v825_v46  ;;  %v1089_v47 = vpop.f32.mrf.mxu1 }
 0x151   :  { %v829_v49 = vpop.f32.mrf.mxu0 }
 0x152   :  { %v1184_v52 = vmax.f32 %v1050_v48, 0.0  ;;  %v830_v53 = vadd.f32 %v3592_v45, %v829_v49 }
 0x153   :  { %v831_v54 = vpop.f32.mrf.mxu0 }
 0x154   :  { %v1222_v55 = vpack.c.bf16 %v1184_v52, %v1183_v51  ;;  %v1055_v57 = vadd.f32 %v1054_v43, %v830_v53  ;;  %v2759_v53 = vpop.f32.mrf.mxu1 }
 0x155   :  { %v832_v56 = vpop.f32.mrf.mxu0 }
 0x156   :  { %v833_v58 = vadd.f32 %v3592_v45, %v832_v56  ;;  %2806 = vmatmul.mubr.bf16.gmra.mxu1 %v1222_v55  ;;  %v1185_v63 = vmax.f32 %v1055_v57, 0.0 }
 0x157   :  { %v834_v59 = vpop.f32.mrf.mxu0 }
 0x158   :  { %v1058_v60 = vadd.f32 %v1057_v16, %v833_v58  ;;  %v1102_v59 = vpop.f32.mrf.mxu1 }
 0x159   :  { %v837_v61 = vpop.f32.mrf.mxu0 }
 0x15a   :  { %v1186_v1 = vmax.f32 %v1058_v60, 0.0  ;;  %v838_v2 = vadd.f32 %v3592_v45, %v837_v61 }
 0x15b   :  { %v839_v3 = vpop.f32.mrf.mxu0 }
 0x15c   :  { %v1223_v4 = vpack.c.bf16 %v1186_v1, %v1185_v63  ;;  %v1063_v7 = vadd.f32 %v2747_v36, %v838_v2  ;;  %v2760_v2 = vpop.f32.mrf.mxu1 }
 0x15d   :  { %v840_v5 = vpop.f32.mrf.mxu0 }
 0x15e   :  { %v841_v8 = vadd.f32 %v3592_v45, %v840_v5  ;;  %2809 = vmatprep.mubr.bf16.mxu1 %v1223_v4  ;;  %v1187_v13 = vmax.f32 %v1063_v7, 0.0 }
 0x15f   :  { %v842_v9 = vpop.f32.mrf.mxu0 }
 0x160   :  { %v1066_v10 = vadd.f32 %v2748_v50, %v841_v8 }
 0x161   :  { %v845_v11 = vpop.f32.mrf.mxu0 }
 0x162   :  { %v1188_v14 = vmax.f32 %v1066_v10, 0.0  ;;  %v846_v15 = vadd.f32 %v3592_v45, %v845_v11  ;;  %v1105_v10 = vpop.f32.mrf.mxu1 }
 0x163   :  { %v847_v17 = vpop.f32.mrf.mxu0 }
 0x164   :  { %v1224_v18 = vpack.c.bf16 %v1188_v14, %v1187_v13  ;;  %v1071_v21 = vadd.f32 %v1070_v6, %v846_v15  ;;  %v2763_v17 = vpop.f32.mrf.mxu1 }
 0x165   :  { %v848_v19 = vpop.f32.mrf.mxu0 }
 0x166   :  { %v849_v22 = vadd.f32 %v3592_v45, %v848_v19  ;;  %2810 = vmatmul.mubr.bf16.gmra.mxu1 %v1224_v18  ;;  %v1189_v27 = vmax.f32 %v1071_v21, 0.0 }
 0x167   :  { %v850_v23 = vpop.f32.mrf.mxu0 }
 0x168   :  { %v1074_v24 = vadd.f32 %v1073_v20, %v849_v22 }
 0x169   :  { %v853_v25 = vpop.f32.mrf.mxu0 }
 0x16a   :  { %v1190_v28 = vmax.f32 %v1074_v24, 0.0  ;;  %v854_v29 = vadd.f32 %v3592_v45, %v853_v25  ;;  %v1118_v24 = vpop.f32.mrf.mxu1 }
 0x16b   :  { %v855_v30 = vpop.f32.mrf.mxu0 }
 0x16c   :  { %v1225_v31 = vpack.c.bf16 %v1190_v28, %v1189_v27  ;;  %v1079_v34 = vadd.f32 %v2751_v62, %v854_v29  ;;  %v2764_v30 = vpop.f32.mrf.mxu1 }
 0x16d   :  { %v856_v32 = vpop.f32.mrf.mxu0 }
 0x16e   :  { %v857_v35 = vadd.f32 %v3592_v45, %v856_v32  ;;  %2813 = vmatprep.mubr.bf16.mxu1 %v1225_v31  ;;  %v1191_v40 = vmax.f32 %v1079_v34, 0.0 }
 0x16f   :  { %v858_v36 = vpop.f32.mrf.mxu0 }
 0x170   :  { %v1082_v37 = vadd.f32 %v2752_v12, %v857_v35 }
 0x171   :  { %v861_v38 = vpop.f32.mrf.mxu0 }
 0x172   :  { %v1192_v41 = vmax.f32 %v1082_v37, 0.0  ;;  %v862_v42 = vadd.f32 %v3592_v45, %v861_v38  ;;  %v1121_v37 = vpop.f32.mrf.mxu1 }
 0x173   :  { %v863_v43 = vpop.f32.mrf.mxu0 }
 0x174   :  { %v1226_v44 = vpack.c.bf16 %v1192_v41, %v1191_v40  ;;  %v1087_v48 = vadd.f32 %v1086_v33, %v862_v42  ;;  %v2767_v43 = vpop.f32.mrf.mxu1 }
 0x175   :  { %v864_v46 = vpop.f32.mrf.mxu0 }
 0x176   :  { %v865_v49 = vadd.f32 %v3592_v45, %v864_v46  ;;  %2814 = vmatmul.mubr.bf16.gmra.mxu1 %v1226_v44  ;;  %v1193_v54 = vmax.f32 %v1087_v48, 0.0 }
 0x177   :  { %v866_v50 = vpop.f32.mrf.mxu0 }
 0x178   :  { %v1090_v51 = vadd.f32 %v1089_v47, %v865_v49 }
 0x179   :  { %v869_v52 = vpop.f32.mrf.mxu0 }
 0x17a   :  { %v1194_v55 = vmax.f32 %v1090_v51, 0.0  ;;  %v870_v56 = vadd.f32 %v3592_v45, %v869_v52  ;;  %v1134_v51 = vpop.f32.mrf.mxu1 }
 0x17b   :  { %v871_v16 = vpop.f32.mrf.mxu0 }
 0x17c   :  { %v1227_v57 = vpack.c.bf16 %v1194_v55, %v1193_v54  ;;  %v1095_v60 = vadd.f32 %v2755_v26, %v870_v56  ;;  %v2768_v16 = vpop.f32.mrf.mxu1 }
 0x17d   :  { %v872_v58 = vpop.f32.mrf.mxu0 }
 0x17e   :  { %v873_v61 = vadd.f32 %v3592_v45, %v872_v58  ;;  %2817 = vmatprep.mubr.bf16.mxu1 %v1227_v57  ;;  %v1195_v3 = vmax.f32 %v1095_v60, 0.0 }
 0x17f   :  { %v874_v62 = vpop.f32.mrf.mxu0 }
 0x180   :  { %v1098_v63 = vadd.f32 %v2756_v39, %v873_v61 }
 0x181   :  { %v877_v1 = vpop.f32.mrf.mxu0 }
 0x182   :  { %v1196_v4 = vmax.f32 %v1098_v63, 0.0  ;;  %v878_v5 = vadd.f32 %v3592_v45, %v877_v1  ;;  %v1137_v63 = vpop.f32.mrf.mxu1 }
 0x183   :  { %v879_v6 = vpop.f32.mrf.mxu0 }
 0x184   :  { %v1103_v7 = vadd.f32 %v1102_v59, %v878_v5  ;;  %v1228_v8 = vpack.c.bf16 %v1196_v4, %v1195_v3  ;;  %v2771_v6 = vpop.f32.mrf.mxu1 }
 0x185   :  { %v880_v9 = vpop.f32.mrf.mxu0 }
 0x186   :  { %v881_v11 = vadd.f32 %v3592_v45, %v880_v9  ;;  %2818 = vmatmul.mubr.bf16.gmra.mxu1 %v1228_v8  ;;  %v1197_v13 = vmax.f32 %v1103_v7, 0.0 }
 0x187   :  { %v882_v12 = vpop.f32.mrf.mxu0 }
 0x188   :  { %v1106_v14 = vadd.f32 %v1105_v10, %v881_v11 }
 0x189   :  { %v885_v15 = vpop.f32.mrf.mxu0 }
 0x18a   :  { %v1198_v18 = vmax.f32 %v1106_v14, 0.0  ;;  %v886_v19 = vadd.f32 %v3592_v45, %v885_v15 }
 0x18b   :  { %v887_v20 = vpop.f32.mrf.mxu0 }
 0x18c   :  { %v1111_v21 = vadd.f32 %v2759_v53, %v886_v19  ;;  %v1229_v22 = vpack.c.bf16 %v1198_v18, %v1197_v13  ;;  %v1150_v13 = vpop.f32.mrf.mxu1 }
 0x18d   :  { %v888_v23 = vpop.f32.mrf.mxu0 }
 0x18e   :  { %v889_v25 = vadd.f32 %v3592_v45, %v888_v23  ;;  %2821 = vmatprep.mubr.bf16.mxu1 %v1229_v22  ;;  %v1199_v27 = vmax.f32 %v1111_v21, 0.0  ;;  %v2772_v20 = vpop.f32.mrf.mxu1 }
 0x18f   :  { %v890_v26 = vpop.f32.mrf.mxu0 }
 0x190   :  { %v1114_v28 = vadd.f32 %v2760_v2, %v889_v25 }
 0x191   :  { %v893_v29 = vpop.f32.mrf.mxu0 }
 0x192   :  { %v1200_v31 = vmax.f32 %v1114_v28, 0.0  ;;  %v894_v32 = vadd.f32 %v3592_v45, %v893_v29 }
 0x193   :  { %v895_v33 = vpop.f32.mrf.mxu0 }
 0x194   :  { %v1119_v34 = vadd.f32 %v1118_v24, %v894_v32  ;;  %v1230_v35 = vpack.c.bf16 %v1200_v31, %v1199_v27  ;;  %v1153_v27 = vpop.f32.mrf.mxu1 }
 0x195   :  { %v896_v36 = vpop.f32.mrf.mxu0 }
 0x196   :  { %v897_v38 = vadd.f32 %v3592_v45, %v896_v36  ;;  %2822 = vmatmul.mubr.bf16.gmra.mxu1 %v1230_v35  ;;  %v1201_v40 = vmax.f32 %v1119_v34, 0.0 }
 0x197   :  { %v898_v39 = vpop.f32.mrf.mxu0 }
 0x198   :  { %v1122_v41 = vadd.f32 %v1121_v37, %v897_v38 }
 0x199   :  { %v901_v42 = vpop.f32.mrf.mxu0 }
 0x19a   :  { %v1202_v44 = vmax.f32 %v1122_v41, 0.0  ;;  %v902_v46 = vadd.f32 %v3592_v45, %v901_v42 }
 0x19b   :  { %v903_v47 = vpop.f32.mrf.mxu0 }
 0x19c   :  { %v1127_v48 = vadd.f32 %v2763_v17, %v902_v46  ;;  %v1231_v49 = vpack.c.bf16 %v1202_v44, %v1201_v40  ;;  %v3126_v46 = vld [vmem:[%s4263_s0 + $0x4] ss:$12 sps:$4 sm:$0xff]  }
 0x19d   :  { %v904_v50 = vpop.f32.mrf.mxu0 }
 0x19e   :  { %v905_v52 = vadd.f32 %v3592_v45, %v904_v50  ;;  %2825 = vmatprep.mubr.bf16.mxu1 %v1231_v49  ;;  %v1203_v54 = vmax.f32 %v1127_v48, 0.0 }
 0x19f   :  { %v906_v53 = vpop.f32.mrf.mxu0 }
 0x1a0   :  { %v1130_v55 = vadd.f32 %v2764_v30, %v905_v52 }
 0x1a1   :  { %v909_v56 = vpop.f32.mrf.mxu0 }
 0x1a2   :  { %v1204_v57 = vmax.f32 %v1130_v55, 0.0  ;;  %v910_v58 = vadd.f32 %v3592_v45, %v909_v56 }
 0x1a3   :  { %v911_v59 = vpop.f32.mrf.mxu0 }
 0x1a4   :  { %v1135_v60 = vadd.f32 %v1134_v51, %v910_v58  ;;  %v1232_v61 = vpack.c.bf16 %v1204_v57, %v1203_v54 }
 0x1a5   :  { %v912_v62 = vpop.f32.mrf.mxu0 }
 0x1a6   :  { %v913_v1 = vadd.f32 %v3592_v45, %v912_v62  ;;  %2826 = vmatmul.mubr.bf16.gmra.mxu1 %v1232_v61  ;;  %v1205_v3 = vmax.f32 %v1135_v60, 0.0 }
 0x1a7   :  { %v914_v2 = vpop.f32.mrf.mxu0 }
 0x1a8   :  { %v1138_v4 = vadd.f32 %v1137_v63, %v913_v1 }
 0x1a9   :  { %v917_v5 = vpop.f32.mrf.mxu0 }
 0x1aa   :  { %v1206_v7 = vmax.f32 %v1138_v4, 0.0  ;;  %v918_v8 = vadd.f32 %v3592_v45, %v917_v5 }
 0x1ab   :  { %v919_v9 = vpop.f32.mrf.mxu0 }
 0x1ac   :  { %v1143_v10 = vadd.f32 %v2767_v43, %v918_v8  ;;  %v1233_v11 = vpack.c.bf16 %v1206_v7, %v1205_v3 }
 0x1ad   :  { %v920_v12 = vpop.f32.mrf.mxu0 }
 0x1ae   :  { %v921_v14 = vadd.f32 %v3592_v45, %v920_v12  ;;  %2829 = vmatprep.mubr.bf16.mxu1 %v1233_v11  ;;  %v1207_v17 = vmax.f32 %v1143_v10, 0.0 }
 0x1af   :  { %v922_v15 = vpop.f32.mrf.mxu0 }
 0x1b0   :  { %v1146_v18 = vadd.f32 %v2768_v16, %v921_v14 }
 0x1b1   :  { %v925_v19 = vpop.f32.mrf.mxu0 }
 0x1b2   :  { %v1208_v21 = vmax.f32 %v1146_v18, 0.0  ;;  %v926_v22 = vadd.f32 %v3592_v45, %v925_v19 }
 0x1b3   :  { %v927_v23 = vpop.f32.mrf.mxu0 }
 0x1b4   :  { %v1151_v24 = vadd.f32 %v1150_v13, %v926_v22  ;;  %v1234_v25 = vpack.c.bf16 %v1208_v21, %v1207_v17 }
 0x1b5   :  { %v928_v26 = vpop.f32.mrf.mxu0 }
 0x1b6   :  { %v929_v28 = vadd.f32 %v3592_v45, %v928_v26  ;;  %2830 = vmatmul.mubr.bf16.gmra.mxu1 %v1234_v25  ;;  %v1209_v30 = vmax.f32 %v1151_v24, 0.0 }
 0x1b7   :  { %v930_v29 = vpop.f32.mrf.mxu0 }
 0x1b8   :  { %v1154_v31 = vadd.f32 %v1153_v27, %v929_v28 }
 0x1b9   :  { %v933_v32 = vpop.f32.mrf.mxu0 }
 0x1ba   :  { %v1210_v33 = vmax.f32 %v1154_v31, 0.0  ;;  %v934_v34 = vadd.f32 %v3592_v45, %v933_v32 }
 0x1bb   :  { %v935_v35 = vpop.f32.mrf.mxu0 }
 0x1bc   :  { %v1159_v36 = vadd.f32 %v2771_v6, %v934_v34  ;;  %v1235_v37 = vpack.c.bf16 %v1210_v33, %v1209_v30 }
 0x1bd   :  { %v936_v38 = vpop.f32.mrf.mxu0 }
 0x1be   :  { %v937_v39 = vadd.f32 %v3592_v45, %v936_v38  ;;  %2833 = vmatprep.mubr.bf16.mxu1 %v1235_v37  ;;  %v1211_v41 = vmax.f32 %v1159_v36, 0.0  ;;  %v3127_v37 = vld [vmem:[%s4263_s0] ss:$12 sps:$4 sm:$0xff]   ;;  %v3128_v38 = vld [vmem:[%s4263_s0 + $0x1c] ss:$12 sps:$4 sm:$0xff]  }
 0x1bf   :  { %v938_v40 = vpop.f32.mrf.mxu0 }
 0x1c0   :  { %v1162_v42 = vadd.f32 %v2772_v20, %v937_v39 }
 0x1c2   :  { %v1212_v43 = vmax.f32 %v1162_v42, 0.0 }
 0x1c4   :  { %v1236_v44 = vpack.c.bf16 %v1212_v43, %v1211_v41  ;;  %v3129_v41 = vld [vmem:[%s4263_s0 + $0x18] ss:$12 sps:$4 sm:$0xff]  }
 0x1c6   :  { %2834 = vmatmul.mubr.bf16.gmra.mxu1 %v1236_v44  ;;  %v3131_v44 = vld [vmem:[%s4263_s0 + $0x30] ss:$12 sps:$4 sm:$0xff]  }
 0x1c7   :  { %1589 = vmatprep.mubr.bf16.mxu1 %v3126_v46  ;;  %v3132_v46 = vld [vmem:[%s4263_s0 + $0x4c] ss:$12 sps:$4 sm:$0xff]  }
 0x1d6   :  { %v2791_v47 = vpop.f32.mrf.mxu1 }
 0x1d8   :  { %v1335_v48 = vpop.f32.mrf.mxu1 }
 0x1da   :  { %v2792_v49 = vpop.f32.mrf.mxu1 }
 0x1db   :  { %v1527_v6 = vpack.c.bf16 %v2792_v49, %v2791_v47  ;;  %v3133_v49 = vld [vmem:[%s4263_s0 + $0x48] ss:$12 sps:$4 sm:$0xff]  }
 0x1dc   :  { %v1338_v50 = vpop.f32.mrf.mxu1 }
 0x1dd   :  { %v1526_v8 = vpack.c.bf16 %v1338_v50, %v1335_v48  ;;  %v3134_v50 = vld [vmem:[%s4263_s0 + $0x64] ss:$12 sps:$4 sm:$0xff]  }
 0x1e6   :  { %v2795_v51 = vpop.f32.mrf.mxu1 }
 0x1e8   :  { %v1351_v52 = vpop.f32.mrf.mxu1 }
 0x1ea   :  { %v2796_v53 = vpop.f32.mrf.mxu1 }
 0x1eb   :  { %v1529_v2 = vpack.c.bf16 %v2796_v53, %v2795_v51 }
 0x1ec   :  { %v1354_v45 = vpop.f32.mrf.mxu1 }
 0x1ed   :  { %v1528_v4 = vpack.c.bf16 %v1354_v45, %v1351_v52 }
 0x1f6   :  { %v2799_v54 = vpop.f32.mrf.mxu1 }
 0x1f8   :  { %v1367_v55 = vpop.f32.mrf.mxu1 }
 0x1fa   :  { %v2800_v56 = vpop.f32.mrf.mxu1 }
 0x1fb   :  { %v1531_v63 = vpack.c.bf16 %v2800_v56, %v2799_v54 }
 0x1fc   :  { %v1370_v16 = vpop.f32.mrf.mxu1 }
 0x1fd   :  { %v1530_v1 = vpack.c.bf16 %v1370_v16, %v1367_v55  ;;  %v3135_v55 = vld [vmem:[%s4263_s0 + $0x60] ss:$12 sps:$4 sm:$0xff]   ;;  %v3136_v16 = vld [vmem:[%s4263_s0 + $0x7c] ss:$12 sps:$4 sm:$0xff]  }
 0x206   :  { %v2803_v57 = vpop.f32.mrf.mxu1 }
 0x208   :  { %v1383_v58 = vpop.f32.mrf.mxu1 }
 0x20a   :  { %v2804_v59 = vpop.f32.mrf.mxu1 }
 0x20b   :  { %v1533_v60 = vpack.c.bf16 %v2804_v59, %v2803_v57 }
 0x20c   :  { %v1386_v61 = vpop.f32.mrf.mxu1 }
 0x20d   :  { %1558 = vmatpush1.bf16.msra.mxu1 %v1533_v60  ;;  %v1532_v62 = vpack.c.bf16 %v1386_v61, %v1383_v58  ;;  %v3137_v58 = vld [vmem:[%s4263_s0 + $0x78] ss:$12 sps:$4 sm:$0xff]   ;;  %v3138_v60 = vld [vmem:[%s4263_s0 + $0x94] ss:$12 sps:$4 sm:$0xff]  }
 0x20e   :  { %1559 = vmatprep.subr.bf16.mxu1 %v3197_v0 }
 0x211   :  { %1560 = vmatpush1.bf16.msra.mxu1 %v1532_v62  ;;  %v3139_v62 = vld [vmem:[%s4263_s0 + $0x90] ss:$12 sps:$4 sm:$0xff]  }
 0x212   :  { %1561 = vmatprep.subr.bf16.mxu1 %v3197_v0 }
 0x215   :  { %1562 = vmatpush1.bf16.msra.mxu1 %v1531_v63 }
 0x216   :  { %1563 = vmatprep.subr.bf16.mxu1 %v3197_v0  ;;  %v2807_v3 = vpop.f32.mrf.mxu1 }
 0x218   :  { %v1399_v5 = vpop.f32.mrf.mxu1 }
 0x219   :  { %1564 = vmatpush1.bf16.msra.mxu1 %v1530_v1  ;;  %v3140_v1 = vld [vmem:[%s4263_s0 + $0xac] ss:$12 sps:$4 sm:$0xff]  }
 0x21a   :  { %1565 = vmatprep.subr.bf16.mxu1 %v3197_v0  ;;  %v2808_v7 = vpop.f32.mrf.mxu1 }
 0x21b   :  { %v1535_v32 = vpack.c.bf16 %v2808_v7, %v2807_v3  ;;  %v3141_v3 = vld [vmem:[%s4263_s0 + $0xa8] ss:$12 sps:$4 sm:$0xff]   ;;  %v3144_v7 = vld [vmem:[%s4263_s0 + $0x20] ss:$12 sps:$4 sm:$0xff]  }
 0x21c   :  { %v1402_v9 = vpop.f32.mrf.mxu1 }
 0x21d   :  { %1566 = vmatpush1.bf16.msra.mxu1 %v1529_v2  ;;  %v1534_v35 = vpack.c.bf16 %v1402_v9, %v1399_v5  ;;  %v3142_v5 = vld [vmem:[%s4263_s0 + $0xc4] ss:$12 sps:$4 sm:$0xff]  }
 0x21e   :  { %1567 = vmatprep.subr.bf16.mxu1 %v3197_v0  ;;  %v3146_v9 = vld [vmem:[%s4263_s0 + $0x38] ss:$12 sps:$4 sm:$0xff]  }
 0x221   :  { %1568 = vmatpush1.bf16.msra.mxu1 %v1528_v4 }
 0x222   :  { %1569 = vmatprep.subr.bf16.mxu1 %v3197_v0 }
 0x225   :  { %1570 = vmatpush1.bf16.msra.mxu1 %v1527_v6  ;;  %v3143_v6 = vld [vmem:[%s4263_s0 + $0xc0] ss:$12 sps:$4 sm:$0xff]  }
 0x226   :  { %1571 = vmatprep.subr.bf16.mxu1 %v3197_v0  ;;  %v2811_v10 = vpop.f32.mrf.mxu1 }
 0x228   :  { %v1415_v11 = vpop.f32.mrf.mxu1 }
 0x229   :  { %1572 = vmatpush1.bf16.msra.mxu1 %v1526_v8  ;;  %v3145_v8 = vld [vmem:[%s4263_s0 + $0xdc] ss:$12 sps:$4 sm:$0xff]  }
 0x22a   :  { %1573 = vmatprep.subr.bf16.mxu1 %v3197_v0  ;;  %v2812_v12 = vpop.f32.mrf.mxu1 }
 0x22b   :  { %v1537_v28 = vpack.c.bf16 %v2812_v12, %v2811_v10  ;;  %v3147_v10 = vld [vmem:[%s4263_s0 + $0xd8] ss:$12 sps:$4 sm:$0xff]   ;;  %v3149_v12 = vld [vmem:[%s4263_s0 + $0xf4] ss:$12 sps:$4 sm:$0xff]  }
 0x22c   :  { %v1418_v13 = vpop.f32.mrf.mxu1 }
 0x22d   :  { %v1536_v30 = vpack.c.bf16 %v1418_v13, %v1415_v11  ;;  %v3148_v11 = vld [vmem:[%s4263_s0 + $0x50] ss:$12 sps:$4 sm:$0xff]   ;;  %v3150_v13 = vld [vmem:[%s4263_s0 + $0x68] ss:$12 sps:$4 sm:$0xff]  }
 0x236   :  { %v2815_v14 = vpop.f32.mrf.mxu1 }
 0x238   :  { %v1431_v15 = vpop.f32.mrf.mxu1 }
 0x23a   :  { %v2816_v17 = vpop.f32.mrf.mxu1 }
 0x23b   :  { %v1539_v25 = vpack.c.bf16 %v2816_v17, %v2815_v14  ;;  %v3151_v14 = vld [vmem:[%s4263_s0 + $0xf0] ss:$12 sps:$4 sm:$0xff]   ;;  %v3153_v17 = vld [vmem:[%s4263_s0 + $0x10c] ss:$12 sps:$4 sm:$0xff]  }
 0x23c   :  { %v1434_v18 = vpop.f32.mrf.mxu1 }
 0x23d   :  { %v1538_v26 = vpack.c.bf16 %v1434_v18, %v1431_v15  ;;  %v3152_v15 = vld [vmem:[%s4263_s0 + $0x80] ss:$12 sps:$4 sm:$0xff]   ;;  %v3154_v18 = vld [vmem:[%s4263_s0 + $0x98] ss:$12 sps:$4 sm:$0xff]  }
 0x246   :  { %v2819_v19 = vpop.f32.mrf.mxu1 }
 0x248   :  { %v1447_v20 = vpop.f32.mrf.mxu1 }
 0x24a   :  { %v2820_v21 = vpop.f32.mrf.mxu1 }
 0x24b   :  { %v1541_v22 = vpack.c.bf16 %v2820_v21, %v2819_v19  ;;  %v3155_v19 = vld [vmem:[%s4263_s0 + $0x108] ss:$12 sps:$4 sm:$0xff]   ;;  %v3157_v21 = vld [vmem:[%s4263_s0 + $0x124] ss:$12 sps:$4 sm:$0xff]  }
 0x24c   :  { %v1450_v23 = vpop.f32.mrf.mxu1 }
 0x24d   :  { %1574 = vmatpush2.bf16.msra.mxu1 %v1541_v22  ;;  %v1540_v24 = vpack.c.bf16 %v1450_v23, %v1447_v20  ;;  %v3156_v20 = vld [vmem:[%s4263_s0 + $0xb0] ss:$12 sps:$4 sm:$0xff]   ;;  %v3158_v22 = vld [vmem:[%s4263_s0 + $0xc8] ss:$12 sps:$4 sm:$0xff]   ;;  %v3159_v23 = vld [vmem:[%s4263_s0 + $0x120] ss:$12 sps:$4 sm:$0xff]  }
 0x24e   :  { %1575 = vmatprep.subr.bf16.mxu1 %v3197_v0 }
 0x251   :  { %1576 = vmatpush2.bf16.msra.mxu1 %v1540_v24  ;;  %v3160_v24 = vld [vmem:[%s4263_s0 + $0xe0] ss:$12 sps:$4 sm:$0xff]  }
 0x252   :  { %1577 = vmatprep.subr.bf16.mxu1 %v3197_v0 }
 0x255   :  { %1578 = vmatpush2.bf16.msra.mxu1 %v1539_v25  ;;  %v3161_v25 = vld [vmem:[%s4263_s0 + $0x13c] ss:$12 sps:$4 sm:$0xff]  }
 0x256   :  { %1579 = vmatprep.subr.bf16.mxu1 %v3197_v0  ;;  %v3656_v27 = vpop.f32.mrf.mxu1 }
 0x258   :  { %v3659_v29 = vpop.f32.mrf.mxu1 }
 0x259   :  { %1580 = vmatpush2.bf16.msra.mxu1 %v1538_v26  ;;  %v3162_v26 = vld [vmem:[%s4263_s0 + $0xf8] ss:$12 sps:$4 sm:$0xff]  }
 0x25a   :  { %1581 = vmatprep.subr.bf16.mxu1 %v3197_v0  ;;  %v3662_v31 = vpop.f32.mrf.mxu1 }
 0x25b   :  { %v1543_v2 = vpack.c.bf16 %v3662_v31, %v3656_v27  ;;  %v3163_v27 = vld [vmem:[%s4263_s0 + $0x138] ss:$12 sps:$4 sm:$0xff]   ;;  %v3167_v31 = vld [vmem:[%s4263_s0 + $0x150] ss:$12 sps:$4 sm:$0xff]  }
 0x25c   :  { %v3665_v33 = vpop.f32.mrf.mxu1 }
 0x25d   :  { %1582 = vmatpush2.bf16.msra.mxu1 %v1537_v28  ;;  %v1542_v4 = vpack.c.bf16 %v3665_v33, %v3659_v29  ;;  %v3164_v28 = vld [vmem:[%s4263_s0 + $0x110] ss:$12 sps:$4 sm:$0xff]   ;;  %v3165_v29 = vld [vmem:[%s4263_s0 + $0x154] ss:$12 sps:$4 sm:$0xff]   ;;  %v3169_v33 = vld [vmem:[%s4263_s0 + $0x16c] ss:$12 sps:$4 sm:$0xff]  }
 0x25e   :  { %1583 = vmatprep.subr.bf16.mxu1 %v3197_v0 }
 0x261   :  { %1584 = vmatpush2.bf16.msra.mxu1 %v1536_v30  ;;  %v3166_v30 = vld [vmem:[%s4263_s0 + $0x128] ss:$12 sps:$4 sm:$0xff]  }
 0x262   :  { %1585 = vmatprep.subr.bf16.mxu1 %v3197_v0 }
 0x265   :  { %1586 = vmatpush2.bf16.msra.mxu1 %v1535_v32  ;;  %v3168_v32 = vld [vmem:[%s4263_s0 + $0x140] ss:$12 sps:$4 sm:$0xff]  }
 0x266   :  { %v2827_v34 = vpop.f32.mrf.mxu1  ;;  %1587 = vmatprep.subr.bf16.mxu1 %v3197_v0  ;;  %v3130_v0 = vld [vmem:[%s4263_s0 + $0x34] ss:$12 sps:$4 sm:$0xff]  }
 0x268   :  { %v1479_v36 = vpop.f32.mrf.mxu1 }
 0x269   :  { %1588 = vmatpush2.bf16.msra.mxu1 %v1534_v35  ;;  %v3171_v35 = vld [vmem:[%s4263_s0 + $0x168] ss:$12 sps:$4 sm:$0xff]  }
 0x26a   :  { %v2828_v39 = vpop.f32.mrf.mxu1 }
 0x26b   :  { %v1545_v61 = vpack.c.bf16 %v2828_v39, %v2827_v34  ;;  %v3170_v34 = vld [vmem:[%s4263_s0 + $0x158] ss:$12 sps:$4 sm:$0xff]   ;;  %v3175_v39 = vld [vmem:[%s4263_s0 + $0x180] ss:$12 sps:$4 sm:$0xff]  }
 0x26c   :  { %1590 = vmatmul.mubr.bf16.vlgmr.msra.gmra.mxu1 %v3127_v37  ;;  %v1482_v40 = vpop.f32.mrf.mxu1  ;;  %v3173_v37 = vld [vmem:[%s4263_s0 + $0x184] ss:$12 sps:$4 sm:$0xff]  }
 0x26d   :  { %1597 = vmatprep.mubr.bf16.mxu1 %v3128_v38  ;;  %v1544_v63 = vpack.c.bf16 %v1482_v40, %v1479_v36  ;;  %v3172_v36 = vld [vmem:[%s4263_s0 + $0x170] ss:$12 sps:$4 sm:$0xff]   ;;  %v3174_v38 = vld [vmem:[%s4263_s0 + $0x188] ss:$12 sps:$4 sm:$0xff]  }
 0x26e   :  { %v3176_v40 = vld [vmem:[%s4263_s0 + $0x19c] ss:$12 sps:$4 sm:$0xff]  }
 0x274   :  { %1598 = vmatmul.mubr.bf16.gmra.mxu1 %v3129_v41  ;;  %v3177_v41 = vld [vmem:[%s4263_s0 + $0x1a0] ss:$12 sps:$4 sm:$0xff]  }
 0x275   :  { %1605 = vmatprep.mubr.bf16.mxu1 %v3130_v0  ;;  %v3178_v0 = vld [vmem:[%s4263_s0 + $0x1b8] ss:$12 sps:$4 sm:$0xff]  }
 0x276   :  { %v2831_v42 = vpop.f32.mrf.mxu1 }
 0x278   :  { %v1495_v43 = vpop.f32.mrf.mxu1 }
 0x27a   :  { %v2832_v47 = vpop.f32.mrf.mxu1 }
 0x27b   :  { %v1547_v57 = vpack.c.bf16 %v2832_v47, %v2831_v42  ;;  %v3179_v42 = vld [vmem:[%s4263_s0 + $0x198] ss:$12 sps:$4 sm:$0xff]   ;;  %v3183_v47 = vld [vmem:[%s4263_s0 + $0x1b0] ss:$12 sps:$4 sm:$0xff]  }
 0x27c   :  { %1606 = vmatmul.mubr.bf16.gmra.mxu1 %v3131_v44  ;;  %v1498_v48 = vpop.f32.mrf.mxu1  ;;  %v3181_v44 = vld [vmem:[%s4263_s0 + $0x1d0] ss:$12 sps:$4 sm:$0xff]  }
 0x27d   :  { %1613 = vmatprep.mubr.bf16.mxu1 %v3132_v46  ;;  %v1546_v59 = vpack.c.bf16 %v1498_v48, %v1495_v43  ;;  %v3180_v43 = vld [vmem:[%s4263_s0 + $0x1b4] ss:$12 sps:$4 sm:$0xff]   ;;  %v3184_v48 = vld [vmem:[%s4263_s0 + $0x1cc] ss:$12 sps:$4 sm:$0xff]  }
 0x27e   :  { %v3182_v46 = vld [vmem:[%s4263_s0 + $0x1e8] ss:$12 sps:$4 sm:$0xff]  }
 0x284   :  { %1614 = vmatmul.mubr.bf16.gmra.mxu1 %v3133_v49  ;;  %v3185_v49 = vld [vmem:[%s4263_s0 + $0x200] ss:$12 sps:$4 sm:$0xff]  }
 0x285   :  { %1621 = vmatprep.mubr.bf16.mxu1 %v3134_v50  ;;  %v3186_v50 = vld [vmem:[%s4263_s0 + $0x218] ss:$12 sps:$4 sm:$0xff]  }
 0x286   :  { %v2835_v51 = vpop.f32.mrf.mxu1 }
 0x288   :  { %v1511_v52 = vpop.f32.mrf.mxu1 }
 0x28a   :  { %v2836_v53 = vpop.f32.mrf.mxu1 }
 0x28b   :  { %v1549_v45 = vpack.c.bf16 %v2836_v53, %v2835_v51  ;;  %v3187_v51 = vld [vmem:[%s4263_s0 + $0x1c8] ss:$12 sps:$4 sm:$0xff]   ;;  %v3189_v53 = vld [vmem:[%s4263_s0 + $0x230] ss:$12 sps:$4 sm:$0xff]  }
 0x28c   :  { %v1514_v54 = vpop.f32.mrf.mxu1  ;;  %1622 = vmatmul.mubr.bf16.gmra.mxu1 %v3135_v55  ;;  %v3192_v55 = vld [vmem:[%s4263_s0 + $0x1f8] ss:$12 sps:$4 sm:$0xff]  }
 0x28d   :  { %v1548_v56 = vpack.c.bf16 %v1514_v54, %v1511_v52  ;;  %2837 = vmatprep.subr.bf16.mxu0 %v1549_v45  ;;  %1629 = vmatprep.mubr.bf16.mxu1 %v3136_v16  ;;  %v3188_v52 = vld [vmem:[%s4263_s0 + $0x1e4] ss:$12 sps:$4 sm:$0xff]   ;;  %v3191_v54 = vld [vmem:[%s4263_s0 + $0x1fc] ss:$12 sps:$4 sm:$0xff]  }
 0x28e   :  { %2838 = vmatpush3.bf16.msra.mxu0 %v1549_v45  ;;  %v3190_v45 = vld [vmem:[%s4263_s0 + $0x1e0] ss:$12 sps:$4 sm:$0xff]   ;;  %v3194_v16 = vld [vmem:[%s4263_s0 + $0x210] ss:$12 sps:$4 sm:$0xff]  }
 0x28f   :  { %2839 = vmatprep.subr.bf16.mxu0 %v1548_v56 }
 0x292   :  { %2840 = vmatpush3.bf16.msra.mxu0 %v1548_v56  ;;  %v3193_v56 = vld [vmem:[%s4263_s0 + $0x214] ss:$12 sps:$4 sm:$0xff]  }
 0x293   :  { %2841 = vmatprep.subr.bf16.mxu0 %v1547_v57 }
 0x294   :  { %1630 = vmatmul.mubr.bf16.gmra.mxu1 %v3137_v58  ;;  %v3196_v58 = vld [vmem:[%s4263_s0 + $0x228] ss:$12 sps:$4 sm:$0xff]  }
 0x295   :  { %1637 = vmatprep.mubr.bf16.mxu1 %v3138_v60 }
 0x296   :  { %2842 = vmatpush3.bf16.msra.mxu0 %v1547_v57  ;;  %v3195_v57 = vld [vmem:[%s4263_s0 + $0x22c] ss:$12 sps:$4 sm:$0xff]  }
 0x297   :  { %2843 = vmatprep.subr.bf16.mxu0 %v1546_v59 }
 0x29a   :  { %2844 = vmatpush3.bf16.msra.mxu0 %v1546_v59 }
 0x29b   :  { %2845 = vmatprep.subr.bf16.mxu0 %v1545_v61 }
 0x29c   :  { %1638 = vmatmul.mubr.bf16.gmra.mxu1 %v3139_v62 }
 0x29d   :  { %1645 = vmatprep.mubr.bf16.mxu1 %v3140_v1 }
 0x29e   :  { %2846 = vmatpush3.bf16.msra.mxu0 %v1545_v61 }
 0x29f   :  { %2847 = vmatprep.subr.bf16.mxu0 %v1544_v63 }
 0x2a2   :  { %2848 = vmatpush3.bf16.msra.mxu0 %v1544_v63 }
 0x2a3   :  { %2849 = vmatprep.subr.bf16.mxu0 %v1543_v2 }
 0x2a4   :  { %1646 = vmatmul.mubr.bf16.gmra.mxu1 %v3141_v3 }
 0x2a5   :  { %1653 = vmatprep.mubr.bf16.mxu1 %v3142_v5 }
 0x2a6   :  { %2850 = vmatpush3.bf16.msra.mxu0 %v1543_v2 }
 0x2a7   :  { %2851 = vmatprep.subr.bf16.mxu0 %v1542_v4 }
 0x2aa   :  { %2852 = vmatpush3.bf16.msra.mxu0 %v1542_v4 }
 0x2ac   :  { %1654 = vmatmul.mubr.bf16.gmra.mxu1 %v3143_v6 }
 0x2ad   :  { %2854 = vmatmul.mubr.bf16.vlgmr.msra.gmra.mxu0 %v3144_v7  ;;  %1661 = vmatprep.mubr.bf16.mxu1 %v3145_v8 }
 0x2ae   :  { %2857 = vmatprep.mubr.bf16.mxu0 %v3146_v9 }
 0x2b4   :  { %1662 = vmatmul.mubr.bf16.gmra.mxu1 %v3147_v10 }
 0x2b5   :  { %2858 = vmatmul.mubr.bf16.gmra.mxu0 %v3148_v11  ;;  %1669 = vmatprep.mubr.bf16.mxu1 %v3149_v12 }
 0x2b6   :  { %2861 = vmatprep.mubr.bf16.mxu0 %v3150_v13 }
 0x2bc   :  { %1670 = vmatmul.mubr.bf16.gmra.mxu1 %v3151_v14 }
 0x2bd   :  { %2862 = vmatmul.mubr.bf16.gmra.mxu0 %v3152_v15  ;;  %1677 = vmatprep.mubr.bf16.mxu1 %v3153_v17 }
 0x2be   :  { %2865 = vmatprep.mubr.bf16.mxu0 %v3154_v18 }
 0x2c4   :  { %1678 = vmatmul.mubr.bf16.gmra.mxu1 %v3155_v19 }
 0x2c5   :  { %2866 = vmatmul.mubr.bf16.gmra.mxu0 %v3156_v20  ;;  %1685 = vmatprep.mubr.bf16.mxu1 %v3157_v21 }
 0x2c6   :  { %2869 = vmatprep.mubr.bf16.mxu0 %v3158_v22 }
 0x2cc   :  { %1686 = vmatmul.mubr.bf16.gmra.mxu1 %v3159_v23 }
 0x2cd   :  { %2870 = vmatmul.mubr.bf16.gmra.mxu0 %v3160_v24  ;;  %1693 = vmatprep.mubr.bf16.mxu1 %v3161_v25  ;;  %v2056_v25 = vlaneseq }
 0x2ce   :  { %2873 = vmatprep.mubr.bf16.mxu0 %v3162_v26 }
 0x2d4   :  { %1694 = vmatmul.mubr.bf16.gmra.mxu1 %v3163_v27  ;;  %v3898_v27 = vshrl.u32 %v2056_v25, 7 }
 0x2d5   :  { %2874 = vmatmul.mubr.bf16.gmra.mxu0 %v3164_v28  ;;  %1701 = vmatprep.mubr.bf16.mxu1 %v3165_v29 }
 0x2d6   :  { %2877 = vmatprep.mubr.bf16.mxu0 %v3166_v30  ;;  %4281 = vst [vmem:[#allocation2_spill] sm:$0xff] %v3898_v27  ;;  %v2064_v29 = vsub.s32 1, %v3898_v27 }
 0x2dc   :  { %1702 = vmatmul.mubr.bf16.gmra.mxu1 %v3167_v31  ;;  %v2055_v31 = vld [vmem:[%s4266_s5] sm:$0x7] }
 0x2dd   :  { %2878 = vmatmul.mubr.bf16.gmra.mxu0 %v3168_v32  ;;  %1709 = vmatprep.mubr.bf16.mxu1 %v3169_v33  ;;  %v2060_v32 = vsub.s32 0, %v3898_v27  ;;  %v2065_v33 = vrot.slane %v2055_v31, %v2064_v29 }
 0x2de   :  { %2881 = vmatprep.mubr.bf16.mxu0 %v3170_v34 }
 0x2df   :  { %vm2071_vm0 = vcmp.eq.s32.totalorder %v3898_v27, %v2065_v33 }
 0x2e4   :  { %1710 = vmatmul.mubr.bf16.gmra.mxu1 %v3171_v35  ;;  %v3907_v35 = vrot.slane %v2055_v31, %v2060_v32 }
 0x2e5   :  { %2882 = vmatmul.mubr.bf16.gmra.mxu0 %v3172_v36  ;;  %1717 = vmatprep.mubr.bf16.mxu1 %v3173_v37  ;;  %v3912_v36 = vld [vmem:[%s4267_s4] ss:$0 sm:$0xff] }
 0x2e6   :  { %2885 = vmatprep.mubr.bf16.mxu0 %v3174_v38  ;;  %4282 = vst [vmem:[#allocation3_spill] sm:$0xff] %v3907_v35  ;;  %vm2070_vm1 = vcmp.eq.s32.totalorder %v3898_v27, %v3907_v35 }
 0x2ec   :  { %1718 = vmatmul.mubr.bf16.gmra.mxu1 %v3175_v39  ;;  %v4273_v39 = vmov 1.0  }
 0x2ed   :  { %1725 = vmatprep.mubr.bf16.mxu1 %v3176_v40  ;;  %2886 = vmatmul.mubr.bf16.gmra.mxu0 %v3177_v41  ;;  %v2068_v41 = vsub.s32 2, %v3898_v27 }
 0x2ee   :  { %2889 = vmatprep.mubr.bf16.mxu0 %v3178_v0 }
 0x2f4   :  { %1726 = vmatmul.mubr.bf16.gmra.mxu1 %v3179_v42 }
 0x2f5   :  { %1733 = vmatprep.mubr.bf16.mxu1 %v3180_v43  ;;  %2890 = vmatmul.mubr.bf16.gmra.mxu0 %v3181_v44  ;;  %v4275_v44 = vmov 0.0  }
 0x2f6   :  { %2893 = vmatprep.mubr.bf16.mxu0 %v3182_v46  ;;  %2971 = vmatprep.subr.mxu1 %v4275_v44 }
 0x2fc   :  { %1734 = vmatmul.mubr.bf16.gmra.mxu1 %v3183_v47  ;;  %v3926_v47 = vrot.slane %v2055_v31, %v2068_v41 }
 0x2fd   :  { %1741 = vmatprep.mubr.bf16.mxu1 %v3184_v48  ;;  %2894 = vmatmul.mubr.bf16.gmra.mxu0 %v3185_v49 }
 0x2fe   :  { %2897 = vmatprep.mubr.bf16.mxu0 %v3186_v50  ;;  %4284 = vst [vmem:[#allocation5_spill] sm:$0xff] %v3926_v47  ;;  %vm2072_vm2 = vcmp.eq.s32.totalorder %v3898_v27, %v3926_v47 }
 0x304   :  { %1742 = vmatmul.mubr.bf16.gmra.mxu1 %v3187_v51 }
 0x305   :  { %1749 = vmatprep.mubr.bf16.mxu1 %v3188_v52  ;;  %2898 = vmatmul.mubr.bf16.gmra.mxu0 %v3189_v53 }
 0x306   :  { %2529 = vmatprep.mubr.msk.f32.mxu0 %vm2071_vm0, %v4273_v39 }
 0x30c   :  { %1750 = vmatmul.mubr.bf16.gmra.mxu1 %v3190_v45 }
 0x30d   :  { %1757 = vmatprep.mubr.bf16.mxu1 %v3191_v54 }
 0x314   :  { %1758 = vmatmul.mubr.bf16.gmra.mxu1 %v3192_v55 }
 0x315   :  { %1765 = vmatprep.mubr.bf16.mxu1 %v3193_v56 }
 0x31c   :  { %1766 = vmatmul.mubr.bf16.gmra.mxu1 %v3194_v16 }
 0x31d   :  { %1773 = vmatprep.mubr.bf16.mxu1 %v3195_v57 }
 0x324   :  { %1774 = vmatmul.mubr.bf16.gmra.mxu1 %v3196_v58 }
 0x325   :  { %2987 = vmatprep.mubr.msk.f32.mxu1 %vm3200_vm3, %v4275_v44 }
 0x32c   :  { %v1591_v59 = vpop.f32.mrf.mxu1 }
 0x32d   :  { %v1592_v0 = vadd.f32 %v3912_v36, %v1591_v59 }
 0x32e   :  { %v1593_v60 = vpop.f32.mrf.mxu1 }
 0x330   :  { %v1594_v61 = vpop.f32.mrf.mxu1 }
 0x331   :  { %v1595_v52 = vadd.f32 %v3912_v36, %v1594_v61 }
 0x332   :  { %v1596_v62 = vpop.f32.mrf.mxu1 }
 0x334   :  { %v1599_v63 = vpop.f32.mrf.mxu1 }
 0x335   :  { %v1600_v37 = vadd.f32 %v3912_v36, %v1599_v63 }
 0x336   :  { %v1601_v1 = vpop.f32.mrf.mxu1 }
 0x338   :  { %v1602_v2 = vpop.f32.mrf.mxu1 }
 0x339   :  { %v1603_v48 = vadd.f32 %v3912_v36, %v1602_v2 }
 0x33a   :  { %v1604_v3 = vpop.f32.mrf.mxu1 }
 0x33c   :  { %v1607_v4 = vpop.f32.mrf.mxu1 }
 0x33d   :  { %v1608_v58 = vadd.f32 %v3912_v36, %v1607_v4 }
 0x33e   :  { %v1609_v5 = vpop.f32.mrf.mxu1 }
 0x340   :  { %v3882_v6 = vpop.f32.mrf.mxu1 }
 0x341   :  { %v1611_v3 = vadd.f32 %v3912_v36, %v3882_v6 }
 0x342   :  { %v1612_v7 = vpop.f32.mrf.mxu1 }
 0x344   :  { %v1615_v8 = vpop.f32.mrf.mxu1 }
 0x345   :  { %v1616_v55 = vadd.f32 %v3912_v36, %v1615_v8 }
 0x346   :  { %v1617_v9 = vpop.f32.mrf.mxu1 }
 0x348   :  { %v1618_v10 = vpop.f32.mrf.mxu1 }
 0x349   :  { %v1619_v63 = vadd.f32 %v3912_v36, %v1618_v10 }
 0x34a   :  { %v1620_v11 = vpop.f32.mrf.mxu1 }
 0x34c   :  { %v3884_v12 = vpop.f32.mrf.mxu1 }
 0x34e   :  { %v1625_v13 = vpop.f32.mrf.mxu1 }
 0x350   :  { %v3886_v14 = vpop.f32.mrf.mxu1 }
 0x352   :  { %v1628_v15 = vpop.f32.mrf.mxu1 }
 0x354   :  { %v3888_v17 = vpop.f32.mrf.mxu1 }
 0x356   :  { %v1633_v18 = vpop.f32.mrf.mxu1 }
 0x358   :  { %v3890_v19 = vpop.f32.mrf.mxu1 }
 0x35a   :  { %v1636_v20 = vpop.f32.mrf.mxu1 }
 0x35c   :  { %v3892_v21 = vpop.f32.mrf.mxu1 }
 0x35e   :  { %v1641_v22 = vpop.f32.mrf.mxu1 }
 0x360   :  { %v3894_v23 = vpop.f32.mrf.mxu1 }
 0x362   :  { %v1644_v24 = vpop.f32.mrf.mxu1 }
 0x364   :  { %v3896_v26 = vpop.f32.mrf.mxu1 }
 0x366   :  { %v1649_v28 = vpop.f32.mrf.mxu1 }
 0x368   :  { %v3901_v30 = vpop.f32.mrf.mxu1 }
 0x36a   :  { %v1652_v34 = vpop.f32.mrf.mxu1 }
 0x36c   :  { %v3916_v38 = vpop.f32.mrf.mxu1 }
 0x36d   :  { %v2855_v40 = vpop.f32.mrf.mxu0 }
 0x36e   :  { %v1657_v42 = vpop.f32.mrf.mxu1  ;;  %v3923_v43 = vadd.f32 %v2855_v40, %v1600_v37 }
 0x36f   :  { %v1816_v46 = vpop.f32.mrf.mxu0 }
 0x370   :  { %4283 = vst [vmem:[#allocation4_spill] sm:$0xff] %v3923_v43  ;;  %v3929_v49 = vpop.f32.mrf.mxu1  ;;  %v3931_v50 = vadd.f32 %v1816_v46, %v1592_v0 }
 0x371   :  { %v2856_v51 = vpop.f32.mrf.mxu0 }
 0x372   :  { %4285 = vst [vmem:[#allocation6_spill] sm:$0xff] %v3931_v50  ;;  %v1660_v53 = vpop.f32.mrf.mxu1  ;;  %v3934_v45 = vadd.f32 %v2856_v51, %v1603_v48 }
 0x373   :  { %v1819_v54 = vpop.f32.mrf.mxu0 }
 0x374   :  { %4286 = vst [vmem:[#allocation7_spill] sm:$0xff] %v3934_v45  ;;  %v3937_v56 = vpop.f32.mrf.mxu1  ;;  %v3939_v16 = vadd.f32 %v1819_v54, %v1595_v52 }
 0x375   :  { %v2859_v57 = vpop.f32.mrf.mxu0 }
 0x376   :  { %4287 = vst [vmem:[#allocation8_spill] sm:$0xff] %v3939_v16  ;;  %v1665_v59 = vpop.f32.mrf.mxu1  ;;  %v3942_v60 = vadd.f32 %v2859_v57, %v1616_v55 }
 0x377   :  { %v1832_v62 = vpop.f32.mrf.mxu0 }
 0x378   :  { %v3945_v61 = vpop.f32.mrf.mxu1  ;;  %v3947_v1 = vadd.f32 %v1832_v62, %v1608_v58 }
 0x379   :  { %v2860_v2 = vpop.f32.mrf.mxu0 }
 0x37a   :  { %v1668_v5 = vpop.f32.mrf.mxu1  ;;  %v3951_v7 = vadd.f32 %v2860_v2, %v1619_v63 }
 0x37b   :  { %v1835_v8 = vpop.f32.mrf.mxu0 }
 0x37c   :  { %v3953_v9 = vpop.f32.mrf.mxu1  ;;  %v3955_v4 = vadd.f32 %v1835_v8, %v1611_v3 }
 0x37d   :  { %v3957_v11 = vpop.f32.mrf.mxu0 }
 0x37e   :  { %v1673_v13 = vpop.f32.mrf.mxu1 }
 0x37f   :  { %v3959_v10 = vpop.f32.mrf.mxu0 }
 0x380   :  { %v3961_v15 = vpop.f32.mrf.mxu1 }
 0x381   :  { %v3963_v18 = vpop.f32.mrf.mxu0 }
 0x382   :  { %v1676_v20 = vpop.f32.mrf.mxu1 }
 0x383   :  { %v3965_v22 = vpop.f32.mrf.mxu0 }
 0x384   :  { %v3967_v6 = vpop.f32.mrf.mxu1 }
 0x385   :  { %v2867_v24 = vpop.f32.mrf.mxu0 }
 0x386   :  { %v1681_v25 = vpop.f32.mrf.mxu1 }
 0x387   :  { %v3969_v28 = vpop.f32.mrf.mxu0 }
 0x388   :  { %v3971_v29 = vpop.f32.mrf.mxu1 }
 0x389   :  { %v2868_v31 = vpop.f32.mrf.mxu0 }
 0x38a   :  { %v1684_v32 = vpop.f32.mrf.mxu1 }
 0x38b   :  { %v1867_v33 = vpop.f32.mrf.mxu0 }
 0x38c   :  { %v3973_v34 = vpop.f32.mrf.mxu1 }
 0x38d   :  { %v3975_v37 = vpop.f32.mrf.mxu0 }
 0x38e   :  { %v1689_v40 = vpop.f32.mrf.mxu1 }
 0x38f   :  { %v3981_v41 = vpop.f32.mrf.mxu0 }
 0x390   :  { %4288 = vst [vmem:[#allocation9_spill] sm:$0xff] %v3981_v41  ;;  %v3983_v0 = vpop.f32.mrf.mxu1 }
 0x391   :  { %v3985_v42 = vpop.f32.mrf.mxu0 }
 0x392   :  { %v1692_v46 = vpop.f32.mrf.mxu1 }
 0x393   :  { %v3987_v48 = vpop.f32.mrf.mxu0 }
 0x394   :  { %v1695_v51 = vpop.f32.mrf.mxu1 }
 0x395   :  { %v3989_v52 = vpop.f32.mrf.mxu0 }
 0x396   :  { %v1697_v53 = vpop.f32.mrf.mxu1 }
 0x397   :  { %v3991_v54 = vpop.f32.mrf.mxu0 }
 0x398   :  { %v1698_v55 = vpop.f32.mrf.mxu1 }
 0x399   :  { %v3993_v57 = vpop.f32.mrf.mxu0 }
 0x39a   :  { %v1700_v58 = vpop.f32.mrf.mxu1 }
 0x39b   :  { %v3995_v59 = vpop.f32.mrf.mxu0  ;;  %v1651_v58 = vadd.f32 %v3912_v36, %v3901_v30 }
 0x39c   :  { %v1703_v62 = vpop.f32.mrf.mxu1 }
 0x39d   :  { %v2879_v63 = vpop.f32.mrf.mxu0  ;;  %v1876_v35 = vadd.f32 %v2868_v31, %v1651_v58  ;;  %v1704_v30 = vadd.f32 %v3912_v36, %v1703_v62 }
 0x39e   :  { %v1705_v2 = vpop.f32.mrf.mxu1 }
 0x39f   :  { %v3997_v3 = vpop.f32.mrf.mxu0  ;;  %v1648_v2 = vadd.f32 %v3912_v36, %v3896_v26  ;;  %v1640_v26 = vadd.f32 %v3912_v36, %v3892_v21  ;;  %v2022_v31 = vmax.f32 %v1876_v35, 0.0 }
 0x3a0   :  { %v1706_v5 = vpop.f32.mrf.mxu1 }
 0x3a1   :  { %v2880_v8 = vpop.f32.mrf.mxu0  ;;  %v1873_v43 = vadd.f32 %v2867_v24, %v1648_v2 }
 0x3a2   :  { %v1708_v13 = vpop.f32.mrf.mxu1 }
 0x3a3   :  { %v1915_v20 = vpop.f32.mrf.mxu0  ;;  %v1707_v13 = vadd.f32 %v3912_v36, %v1706_v5  ;;  %v1699_v5 = vadd.f32 %v3912_v36, %v1698_v55  ;;  %v2021_v24 = vmax.f32 %v1873_v43, 0.0 }
 0x3a4   :  { %v1711_v25 = vpop.f32.mrf.mxu1 }
 0x3a5   :  { %v2883_v32 = vpop.f32.mrf.mxu0  ;;  %v1712_v46 = vadd.f32 %v3912_v36, %v1711_v25  ;;  %v1643_v25 = vadd.f32 %v3912_v36, %v3894_v23  ;;  %v1635_v23 = vadd.f32 %v3912_v36, %v3890_v19  ;;  %v1924_v21 = vadd.f32 %v2880_v8, %v1699_v5 }
 0x3a6   :  { %v1713_v40 = vpop.f32.mrf.mxu1  ;;  %v1691_v19 = vadd.f32 %v3912_v36, %v3983_v0  ;;  %v1624_v0 = vadd.f32 %v3912_v36, %v3884_v12  ;;  %v1680_v12 = vadd.f32 %v3912_v36, %v3967_v6  ;;  %v1672_v6 = vadd.f32 %v3912_v36, %v3953_v9 }
 0x3a7   :  { %v1928_v53 = vpop.f32.mrf.mxu0  ;;  %v1937_v50 = vadd.f32 %v2883_v32, %v1712_v46  ;;  %v1865_v32 = vadd.f32 %v3969_v28, %v1640_v26  ;;  %v2034_v2 = vmax.f32 %v1924_v21, 0.0  ;;  %v2013_v21 = vmax.f32 %v3942_v60, 0.0 }
 0x3a8   :  { %v1714_v39 = vpop.f32.mrf.mxu1  ;;  %v1659_v60 = vadd.f32 %v3912_v36, %v3929_v49 }
 0x3a9   :  { %v1715_v44 = vadd.f32 %v3912_v36, %v1714_v39  ;;  %v2884_v47 = vpop.f32.mrf.mxu0  ;;  %v2019_v8 = vmax.f32 %v1865_v32, 0.0 }
 0x3aa   :  { %v1716_v27 = vpop.f32.mrf.mxu1 }
 0x3ab   :  { %v1940_v16 = vadd.f32 %v2884_v47, %v1715_v44  ;;  %v1931_v40 = vpop.f32.mrf.mxu0  ;;  %v1868_v27 = vadd.f32 %v1867_v33, %v1643_v25  ;;  %v2037_v44 = vmax.f32 %v1937_v50, 0.0  ;;  %v1929_v47 = vadd.f32 %v1928_v53, %v1704_v30 }
 0x3ac   :  { %v4008_v41 = vpop.f32.mrf.mxu1  ;;  %v1932_v45 = vadd.f32 %v1931_v40, %v1707_v13  ;;  %v1632_v33 = vadd.f32 %v3912_v36, %v3888_v17  ;;  %v1860_v50 = vadd.f32 %v3963_v18, %v1635_v23  ;;  %v1688_v18 = vadd.f32 %v3912_v36, %v3973_v34 }
 0x3ad   :  { %v2038_v39 = vmax.f32 %v1940_v16, 0.0  ;;  %v1696_v16 = vadd.f32 %v3912_v36, %v1695_v51  ;;  %v2020_v55 = vmax.f32 %v1868_v27, 0.0  ;;  %v2035_v28 = vmax.f32 %v1929_v47, 0.0  ;;  %v4030_v17 = vpop.f32.mrf.mxu0 }
 0x3ae   :  { %v1721_v58 = vpop.f32.mrf.mxu1  ;;  %v2036_v35 = vmax.f32 %v1932_v45, 0.0  ;;  %v1627_v51 = vadd.f32 %v3912_v36, %v3886_v14  ;;  %v1857_v45 = vadd.f32 %v3957_v11, %v1632_v33  ;;  %v1916_v13 = vadd.f32 %v1915_v20, %v1691_v19 }
 0x3af   :  { %2631 = vmatprep.subr.mxu0 %v2038_v39  ;;  %v1921_v43 = vadd.f32 %v2879_v63, %v1696_v16  ;;  %v2018_v63 = vmax.f32 %v1860_v50, 0.0  ;;  %v1683_v11 = vadd.f32 %v3912_v36, %v3971_v29  ;;  %v1913_v30 = vadd.f32 %v3997_v3, %v1688_v18  ;;  %v4043_v26 = vpop.f32.mrf.mxu0 }
 0x3b0   :  { %v4017_v62 = vpop.f32.mrf.mxu1  ;;  %2632 = vmatpush3.msra.mxu0 %v2022_v31  ;;  %v1852_v14 = vadd.f32 %v3965_v22, %v1627_v51  ;;  %v2017_v39 = vmax.f32 %v1857_v45, 0.0  ;;  %v1849_v34 = vadd.f32 %v3959_v10, %v1624_v0  ;;  %v2032_v31 = vmax.f32 %v1916_v13, 0.0  ;;  %v4292_v0 = vld [vmem:[#allocation8_spill] sm:$0xff] }
 0x3b1   :  { %2633 = vmatprep.subr.mxu0 %v2037_v44  ;;  %v2033_v25 = vmax.f32 %v1921_v43, 0.0  ;;  %v1908_v22 = vadd.f32 %v3993_v57, %v1683_v11  ;;  %v1675_v3 = vadd.f32 %v3912_v36, %v3961_v15  ;;  %v1905_v10 = vadd.f32 %v3989_v52, %v1680_v12  ;;  %v4053_v47 = vpop.f32.mrf.mxu0  ;;  %v4293_v11 = vld [vmem:[#allocation6_spill] sm:$0xff] }
 0x3b2   :  { %v1724_v46 = vpop.f32.mrf.mxu1  ;;  %2634 = vmatpush3.msra.mxu0 %v2021_v24  ;;  %v2016_v29 = vmax.f32 %v1852_v14, 0.0  ;;  %v2031_v58 = vmax.f32 %v1913_v30, 0.0  ;;  %v2015_v5 = vmax.f32 %v1849_v34, 0.0  ;;  %v2014_v24 = vmax.f32 %v3951_v7, 0.0 }
 0x3b3   :  { %2635 = vmatprep.subr.mxu0 %v2036_v35  ;;  %v2030_v57 = vmax.f32 %v1908_v22, 0.0  ;;  %v1900_v23 = vadd.f32 %v3995_v59, %v1675_v3  ;;  %v1667_v52 = vadd.f32 %v3912_v36, %v3945_v61  ;;  %v2029_v32 = vmax.f32 %v1905_v10, 0.0  ;;  %v4065_v9 = vpop.f32.mrf.mxu0 }
 0x3b4   :  { %v4028_v53 = vpop.f32.mrf.mxu1  ;;  %2636 = vmatpush3.msra.mxu0 %v2020_v55  ;;  %v1897_v16 = vadd.f32 %v3991_v54, %v1672_v6  ;;  %v1664_v59 = vadd.f32 %v3912_v36, %v3937_v56  ;;  %v2012_v61 = vmax.f32 %v3955_v4, 0.0  ;;  %v2011_v19 = vmax.f32 %v3947_v1, 0.0  ;;  %v4291_v1 = vld [vmem:[#allocation4_spill] sm:$0xff] }
 0x3b5   :  { %2637 = vmatprep.subr.mxu0 %v2035_v28  ;;  %v1892_v7 = vadd.f32 %v3985_v42, %v1667_v52  ;;  %v2028_v33 = vmax.f32 %v1900_v23, 0.0  ;;  %v4071_v54 = vpop.f32.mrf.mxu0  ;;  %v1656_v42 = vadd.f32 %v3912_v36, %v3916_v38  ;;  %v1884_v43 = vadd.f32 %v3987_v48, %v1659_v60  ;;  %v4289_v28 = vld [vmem:[#allocation7_spill] sm:$0xff] }
 0x3b6   :  { %v1729_v40 = vpop.f32.mrf.mxu1  ;;  %2638 = vmatpush3.msra.mxu0 %v2019_v8  ;;  %v1889_v55 = vadd.f32 %v3975_v37, %v1664_v59  ;;  %v2027_v46 = vmax.f32 %v1897_v16, 0.0  ;;  %v2010_v51 = vmax.f32 %v4289_v28, 0.0  ;;  %v4290_v8 = vld [vmem:[#allocation9_spill] sm:$0xff]  ;;  %v2008_v48 = vmax.f32 %v4292_v0, 0.0 }
 0x3b7   :  { %2639 = vmatprep.subr.mxu0 %v2034_v2  ;;  %v2026_v4 = vmax.f32 %v1892_v7, 0.0  ;;  %v4083_v49 = vpop.f32.mrf.mxu0  ;;  %v1881_v18 = vadd.f32 %v4290_v8, %v1656_v42  ;;  %v2009_v2 = vmax.f32 %v4291_v1, 0.0  ;;  %v2024_v38 = vmax.f32 %v1884_v43, 0.0 }
 0x3b8   :  { %v4041_v20 = vpop.f32.mrf.mxu1  ;;  %2640 = vmatpush3.msra.mxu0 %v2018_v63  ;;  %v2025_v37 = vmax.f32 %v1889_v55, 0.0  ;;  %v4294_v12 = vmov 0.0   ;;  %v4295_v22 = vmov 1.0  }
 0x3b9   :  { %2641 = vmatprep.subr.mxu0 %v2033_v25  ;;  %v4090_v14 = vpop.f32.mrf.mxu0  ;;  %v2023_v40 = vmax.f32 %v1881_v18, 0.0  ;;  %v2007_v25 = vmax.f32 %v4293_v11, 0.0 }
 0x3ba   :  { %v1732_v27 = vpop.f32.mrf.mxu1  ;;  %2642 = vmatpush3.msra.mxu0 %v2017_v39 }
 0x3bb   :  { %2643 = vmatprep.subr.mxu0 %v2032_v31  ;;  %v4093_v34 = vpop.f32.mrf.mxu0  ;;  %v2230_v31 = vld [vmem:[%s4268_s6 + $0x58] sm:$0xff] }
 0x3bc   :  { %v4051_v44 = vpop.f32.mrf.mxu1  ;;  %2644 = vmatpush3.msra.mxu0 %v2016_v29 }
 0x3bd   :  { %2645 = vmatprep.subr.mxu0 %v2031_v58  ;;  %v2895_v3 = vpop.f32.mrf.mxu0 }
 0x3be   :  { %v1737_v15 = vpop.f32.mrf.mxu1  ;;  %2646 = vmatpush3.msra.mxu0 %v2015_v5 }
 0x3bf   :  { %2647 = vmatprep.subr.mxu0 %v2030_v57  ;;  %v1976_v5 = vpop.f32.mrf.mxu0 }
 0x3c0   :  { %v4063_v35 = vpop.f32.mrf.mxu1  ;;  %2648 = vmatpush3.msra.mxu0 %v2014_v24 }
 0x3c1   :  { %2649 = vmatprep.subr.mxu0 %v2029_v32  ;;  %v2896_v23 = vpop.f32.mrf.mxu0 }
 0x3c2   :  { %v1740_v50 = vpop.f32.mrf.mxu1  ;;  %2650 = vmatpush3.msra.mxu0 %v2013_v21 }
 0x3c3   :  { %2651 = vmatprep.subr.mxu0 %v2028_v33  ;;  %v1979_v52 = vpop.f32.mrf.mxu0 }
 0x3c4   :  { %v4077_v56 = vpop.f32.mrf.mxu1  ;;  %2652 = vmatpush3.msra.mxu0 %v2012_v61 }
 0x3c5   :  { %2653 = vmatprep.subr.mxu0 %v2027_v46  ;;  %v2899_v16 = vpop.f32.mrf.mxu0 }
 0x3c6   :  { %v1745_v45 = vpop.f32.mrf.mxu1  ;;  %2654 = vmatpush3.msra.mxu0 %v2011_v19 }
 0x3c7   :  { %2655 = vmatprep.subr.mxu0 %v2026_v4  ;;  %v1992_v7 = vpop.f32.mrf.mxu0 }
 0x3c8   :  { %v4087_v13 = vpop.f32.mrf.mxu1  ;;  %2656 = vmatpush3.msra.mxu0 %v2010_v51 }
 0x3c9   :  { %2657 = vmatprep.subr.mxu0 %v2025_v37  ;;  %v2900_v50 = vpop.f32.mrf.mxu0 }
 0x3ca   :  { %v1748_v63 = vpop.f32.mrf.mxu1  ;;  %2658 = vmatpush3.msra.mxu0 %v2009_v2 }
 0x3cb   :  { %2659 = vmatprep.subr.mxu0 %v2024_v38  ;;  %v1995_v42 = vpop.f32.mrf.mxu0 }
 0x3cc   :  { %v1751_v30 = vpop.f32.mrf.mxu1  ;;  %2660 = vmatpush3.msra.mxu0 %v2008_v48 }
 0x3cd   :  { %2661 = vmatprep.subr.mxu0 %v2023_v40  ;;  %v1752_v63 = vadd.f32 %v3912_v36, %v1751_v30  ;;  %v1739_v30 = vadd.f32 %v3912_v36, %v4063_v35 }
 0x3ce   :  { %v1753_v39 = vpop.f32.mrf.mxu1  ;;  %2662 = vmatpush3.msra.mxu0 %v2007_v25  ;;  %v1747_v25 = vadd.f32 %v3912_v36, %v4087_v13  ;;  %v1736_v13 = vadd.f32 %v3912_v36, %v4051_v44 }
 0x3cf   :  { %2901 = vmatprep.subr.mxu0 %v4294_v12  ;;  %2530 = vmatmul.mubr.msk.f32.vlgmr.msra.gmra.mxu0 %vm2070_vm1, %v4295_v22  ;;  %v1964_v35 = vadd.f32 %v4093_v34, %v1739_v30  ;;  %v1720_v34 = vadd.f32 %v3912_v36, %v4008_v41  ;;  %v2234_v41 = vld [vmem:[%s4268_s6 + $0x78] sm:$0xff] }
 0x3d0   :  { %v1754_v27 = vpop.f32.mrf.mxu1  ;;  %2933 = vmatprep.mubr.msk.f32.mxu0 %vm3200_vm3, %v4294_v12  ;;  %v1961_v44 = vadd.f32 %v4083_v49, %v1736_v13 }
 0x3d1   :  { %v1755_v38 = vadd.f32 %v3912_v36, %v1754_v27  ;;  %v1744_v27 = vadd.f32 %v3912_v36, %v4077_v56 }
 0x3d2   :  { %v1756_v10 = vpop.f32.mrf.mxu1 }
 0x3d3   :  { %v1980_v29 = vadd.f32 %v1979_v52, %v1755_v38  ;;  %v2043_v52 = vmax.f32 %v1961_v44, 0.0 }
 0x3d4   :  { %v1759_v58 = vpop.f32.mrf.mxu1 }
 0x3d5   :  { %v1760_v18 = vadd.f32 %v3912_v36, %v1759_v58  ;;  %v1977_v58 = vadd.f32 %v1976_v5, %v1752_v63  ;;  %v1731_v5 = vadd.f32 %v3912_v36, %v4041_v20  ;;  %v2313_v63 = vld [vmem:[%s4269_s8] sm:$0xff] }
 0x3d6   :  { %v1761_v6 = vpop.f32.mrf.mxu1 }
 0x3d7   :  { %v1985_v40 = vadd.f32 %v2895_v3, %v1760_v18  ;;  %v1972_v3 = vadd.f32 %v4090_v14, %v1747_v25  ;;  %v2048_v6 = vmax.f32 %v1980_v29, 0.0  ;;  %v2047_v56 = vmax.f32 %v1977_v58, 0.0 }
 0x3d8   :  { %v1762_v57 = vpop.f32.mrf.mxu1  ;;  %v1728_v14 = vadd.f32 %v3912_v36, %v4028_v53  ;;  %v1956_v20 = vadd.f32 %v4053_v47, %v1731_v5  ;;  %v1945_v47 = vadd.f32 %v4043_v26, %v1720_v34  ;;  %v2233_v26 = vld [vmem:[%s4268_s6 + $0x70] sm:$0xff] }
 0x3d9   :  { %v1763_v45 = vadd.f32 %v3912_v36, %v1762_v57  ;;  %v2049_v10 = vmax.f32 %v1985_v40, 0.0  ;;  %v1969_v57 = vadd.f32 %v4071_v54, %v1744_v27  ;;  %v1723_v54 = vadd.f32 %v3912_v36, %v4017_v62  ;;  %v2532_v40 = vld [vmem:[%s4270_s7] ss:$0 sm:$0xff] }
 0x3da   :  { %v1764_v24 = vpop.f32.mrf.mxu1  ;;  %v1953_v53 = vadd.f32 %v4030_v17, %v1728_v14  ;;  %v2042_v49 = vmax.f32 %v1956_v20, 0.0  ;;  %v2533_v27 = vld [vmem:[%s4271_s9] ss:$0 sm:$0xff] }
 0x3db   :  { %v1988_v0 = vadd.f32 %v2896_v23, %v1763_v45  ;;  %v2046_v23 = vmax.f32 %v1972_v3, 0.0  ;;  %v2045_v24 = vmax.f32 %v1969_v57, 0.0  ;;  %v2316_v45 = vld [vmem:[%s4269_s8 + $0x18] sm:$0xff] }
 0x3dc   :  { %v1767_v15 = vpop.f32.mrf.mxu1  ;;  %v2041_v62 = vmax.f32 %v1953_v53, 0.0 }
 0x3dd   :  { %v1768_v43 = vadd.f32 %v3912_v36, %v1767_v15  ;;  %v2050_v39 = vmax.f32 %v1988_v0, 0.0  ;;  %v2044_v15 = vmax.f32 %v1964_v35, 0.0  ;;  %v2315_v0 = vld [vmem:[%s4269_s8 + $0x10] sm:$0xff] }
 0x3de   :  { %v1769_v32 = vpop.f32.mrf.mxu1 }
 0x3df   :  { %v1993_v2 = vadd.f32 %v1992_v7, %v1768_v43  ;;  %v1948_v32 = vadd.f32 %v4065_v9, %v1723_v54  ;;  %v2232_v9 = vld [vmem:[%s4268_s6 + $0x68] sm:$0xff]  ;;  %v2227_v7 = vld [vmem:[%s4268_s6 + $0x40] sm:$0xff]  ;;  %v2319_v43 = vld [vmem:[%s4269_s8 + $0x30] sm:$0xff] }
 0x3e0   :  { %v1770_v21 = vpop.f32.mrf.mxu1 }
 0x3e1   :  { %v1771_v46 = vadd.f32 %v3912_v36, %v1770_v21  ;;  %v2051_v11 = vmax.f32 %v1993_v2, 0.0  ;;  %v2229_v21 = vld [vmem:[%s4268_s6 + $0x50] sm:$0xff] }
 0x3e2   :  { %v1772_v59 = vpop.f32.mrf.mxu1 }
 0x3e3   :  { %v1996_v8 = vadd.f32 %v1995_v42, %v1771_v46  ;;  %v2228_v59 = vld [vmem:[%s4268_s6 + $0x48] sm:$0xff]  ;;  %v2221_v46 = vld [vmem:[%s4268_s6 + $0x10] sm:$0xff]  ;;  %v2219_v42 = vld [vmem:[%s4268_s6] sm:$0xff] }
 0x3e4   :  { %v1775_v33 = vpop.f32.mrf.mxu1 }
 0x3e5   :  { %v1776_v60 = vadd.f32 %v3912_v36, %v1775_v33  ;;  %v2052_v48 = vmax.f32 %v1996_v8, 0.0  ;;  %v2226_v33 = vld [vmem:[%s4268_s6 + $0x38] sm:$0xff] }
 0x3e6   :  { %v1777_v61 = vpop.f32.mrf.mxu1 }
 0x3e7   :  { %v2001_v28 = vadd.f32 %v2899_v16, %v1776_v60  ;;  %v2040_v16 = vmax.f32 %v1948_v32, 0.0  ;;  %v2225_v61 = vld [vmem:[%s4268_s6 + $0x30] sm:$0xff]  ;;  %v2223_v60 = vld [vmem:[%s4268_s6 + $0x20] sm:$0xff] }
 0x3e8   :  { %v1778_v55 = vpop.f32.mrf.mxu1 }
 0x3e9   :  { %v1779_v19 = vadd.f32 %v3912_v36, %v1778_v55  ;;  %v2053_v1 = vmax.f32 %v2001_v28, 0.0  ;;  %v2039_v36 = vmax.f32 %v1945_v47, 0.0  ;;  %v2222_v55 = vld [vmem:[%s4268_s6 + $0x18] sm:$0xff]  ;;  %v2318_v28 = vld [vmem:[%s4269_s8 + $0x28] sm:$0xff] }
 0x3ea   :  { %v1780_v4 = vpop.f32.mrf.mxu1 }
 0x3eb   :  { %v2004_v51 = vadd.f32 %v2900_v50, %v1779_v19  ;;  %v2224_v50 = vld [vmem:[%s4268_s6 + $0x28] sm:$0xff]  ;;  %v2320_v4 = vld [vmem:[%s4269_s8 + $0x38] sm:$0xff] }
 0x3ec   :  { %v2220_v19 = vld [vmem:[%s4268_s6 + $0x8] sm:$0xff]  ;;  %2972 = vmatpush3.msra.mxu1 %v2320_v4 }
 0x3ed   :  { %v2054_v37 = vmax.f32 %v2004_v51, 0.0  ;;  %2973 = vmatprep.subr.mxu1 %v4294_v12  ;;  %v2317_v51 = vld [vmem:[%s4269_s8 + $0x20] sm:$0xff] }
 0x3ee   :  { %2974 = vmatpush3.msra.mxu1 %v2319_v43 }
 0x3ef   :  { %2902 = vmatpush3.msra.mxu0 %v2054_v37  ;;  %2975 = vmatprep.subr.mxu1 %v4294_v12 }
 0x3f0   :  { %2903 = vmatprep.subr.mxu0 %v4294_v12  ;;  %2976 = vmatpush3.msra.mxu1 %v2318_v28 }
 0x3f1   :  { %2904 = vmatpush3.msra.mxu0 %v2053_v1  ;;  %2977 = vmatprep.subr.mxu1 %v4294_v12 }
 0x3f2   :  { %2905 = vmatprep.subr.mxu0 %v4294_v12  ;;  %2978 = vmatpush3.msra.mxu1 %v2317_v51 }
 0x3f3   :  { %2906 = vmatpush3.msra.mxu0 %v2052_v48  ;;  %2979 = vmatprep.subr.mxu1 %v4294_v12  ;;  %v2314_v48 = vld [vmem:[%s4269_s8 + $0x8] sm:$0xff] }
 0x3f4   :  { %2907 = vmatprep.subr.mxu0 %v4294_v12  ;;  %2980 = vmatpush3.msra.mxu1 %v2316_v45 }
 0x3f5   :  { %2908 = vmatpush3.msra.mxu0 %v2051_v11  ;;  %2981 = vmatprep.subr.mxu1 %v4294_v12 }
 0x3f6   :  { %2909 = vmatprep.subr.mxu0 %v4294_v12  ;;  %2982 = vmatpush3.msra.mxu1 %v2315_v0 }
 0x3f7   :  { %2910 = vmatpush3.msra.mxu0 %v2050_v39  ;;  %2983 = vmatprep.subr.mxu1 %v4294_v12 }
 0x3f8   :  { %2911 = vmatprep.subr.mxu0 %v4294_v12  ;;  %2984 = vmatpush3.msra.mxu1 %v2314_v48 }
 0x3f9   :  { %2912 = vmatpush3.msra.mxu0 %v2049_v10  ;;  %2985 = vmatprep.subr.mxu1 %v4294_v12 }
 0x3fa   :  { %2913 = vmatprep.subr.mxu0 %v4294_v12  ;;  %2986 = vmatpush3.msra.mxu1 %v2313_v63 }
 0x3fb   :  { %2914 = vmatpush3.msra.mxu0 %v2048_v6 }
 0x3fc   :  { %2915 = vmatprep.subr.mxu0 %v4294_v12 }
 0x3fd   :  { %2916 = vmatpush3.msra.mxu0 %v2047_v56 }
 0x3fe   :  { %2917 = vmatprep.subr.mxu0 %v4294_v12 }
 0x3ff   :  { %2918 = vmatpush3.msra.mxu0 %v2046_v23 }
 0x400   :  { %2919 = vmatprep.subr.mxu0 %v4294_v12 }
 0x401   :  { %2920 = vmatpush3.msra.mxu0 %v2045_v24 }
 0x402   :  { %2921 = vmatprep.subr.mxu0 %v4294_v12 }
 0x403   :  { %2922 = vmatpush3.msra.mxu0 %v2044_v15 }
 0x404   :  { %2923 = vmatprep.subr.mxu0 %v4294_v12 }
 0x405   :  { %2924 = vmatpush3.msra.mxu0 %v2043_v52 }
 0x406   :  { %2925 = vmatprep.subr.mxu0 %v4294_v12 }
 0x407   :  { %2926 = vmatpush3.msra.mxu0 %v2042_v49 }
 0x408   :  { %2927 = vmatprep.subr.mxu0 %v4294_v12 }
 0x409   :  { %2928 = vmatpush3.msra.mxu0 %v2041_v62 }
 0x40a   :  { %2929 = vmatprep.subr.mxu0 %v4294_v12 }
 0x40b   :  { %2930 = vmatpush3.msra.mxu0 %v2040_v16 }
 0x40c   :  { %2931 = vmatprep.subr.mxu0 %v4294_v12 }
 0x40d   :  { %2932 = vmatpush3.msra.mxu0 %v2039_v36 }
 0x40e   :  { %2934 = vmatmul.mubr.msk.f32.vlgmr.msra.gmra.mxu0 %vm2072_vm2, %v4295_v22  ;;  %2936 = vmatprep.subr.mxu0 %v4294_v12  ;;  %v2231_v22 = vld [vmem:[%s4268_s6 + $0x60] sm:$0xff] }
 0x40f   :  { %2937 = vmatpush3.msra.mxu0 %v2234_v41  ;;  %2968 = vmatprep.mubr.msk.f32.mxu0 %vm3200_vm3, %v4294_v12 }
 0x410   :  { %2938 = vmatprep.subr.mxu0 %v4294_v12 }
 0x411   :  { %2939 = vmatpush3.msra.mxu0 %v2233_v26 }
 0x412   :  { %2940 = vmatprep.subr.mxu0 %v4294_v12 }
 0x413   :  { %2941 = vmatpush3.msra.mxu0 %v2232_v9 }
 0x414   :  { %2942 = vmatprep.subr.mxu0 %v4294_v12 }
 0x415   :  { %2943 = vmatpush3.msra.mxu0 %v2231_v22 }
 0x416   :  { %2944 = vmatprep.subr.mxu0 %v4294_v12 }
 0x417   :  { %2945 = vmatpush3.msra.mxu0 %v2230_v31 }
 0x418   :  { %2946 = vmatprep.subr.mxu0 %v4294_v12 }
 0x419   :  { %2947 = vmatpush3.msra.mxu0 %v2229_v21 }
 0x41a   :  { %2948 = vmatprep.subr.mxu0 %v4294_v12 }
 0x41b   :  { %2949 = vmatpush3.msra.mxu0 %v2228_v59 }
 0x41c   :  { %2950 = vmatprep.subr.mxu0 %v4294_v12 }
 0x41d   :  { %2951 = vmatpush3.msra.mxu0 %v2227_v7 }
 0x41e   :  { %2952 = vmatprep.subr.mxu0 %v4294_v12 }
 0x41f   :  { %2953 = vmatpush3.msra.mxu0 %v2226_v33 }
 0x420   :  { %2954 = vmatprep.subr.mxu0 %v4294_v12 }
 0x421   :  { %2955 = vmatpush3.msra.mxu0 %v2225_v61 }
 0x422   :  { %2956 = vmatprep.subr.mxu0 %v4294_v12 }
 0x423   :  { %2957 = vmatpush3.msra.mxu0 %v2224_v50 }
 0x424   :  { %2958 = vmatprep.subr.mxu0 %v4294_v12 }
 0x425   :  { %2959 = vmatpush3.msra.mxu0 %v2223_v60 }
 0x426   :  { %2960 = vmatprep.subr.mxu0 %v4294_v12 }
 0x427   :  { %2961 = vmatpush3.msra.mxu0 %v2222_v55 }
 0x428   :  { %2962 = vmatprep.subr.mxu0 %v4294_v12 }
 0x429   :  { %2963 = vmatpush3.msra.mxu0 %v2221_v46 }
 0x42a   :  { %2964 = vmatprep.subr.mxu0 %v4294_v12 }
 0x42b   :  { %2965 = vmatpush3.msra.mxu0 %v2220_v19 }
 0x42c   :  { %2966 = vmatprep.subr.mxu0 %v4294_v12 }
 0x42d   :  { %2967 = vmatpush3.msra.mxu0 %v2219_v42 }
 0x48f   :  { %v2663_v37 = vpop.f32.mrf.mxu0 }
 0x491   :  { %v2664_v8 = vpop.f32.mrf.mxu0 }
 0x492   :  { %v2665_v18 = vadd.f32 %v2664_v8, %v2663_v37 }
 0x4ce   :  { %v2215_v1 = vpop.f32.mrf.mxu0 }
 0x4cf   :  { %v2216_v2 = vadd.f32 %v2665_v18, %v2215_v1 }
 0x4d0   :  { %v2935_v38 = vpop.f32.mrf.mxu0 }
 0x4d1   :  { %2969 = vmatmul.mubr.f32.vlgmr.msra.gmra.mxu0 %v2216_v2 }
 0x591   :  { %v2308_v11 = vpop.f32.mrf.mxu0 }
 0x592   :  { %v2309_v25 = vadd.f32 %v2532_v40, %v2308_v11 }
 0x593   :  { %v2970_v39 = vpop.f32.mrf.mxu0 }
 0x594   :  { %v2312_v29 = vmax.f32 %v2309_v25, 0.0 }
 0x596   :  { %2988 = vmatmul.mubr.msk.f32.vlgmr.msra.gmra.mxu1 %vm2328_vm4, %v2312_v29 }
 0x656   :  { %v2398_v12 = vpop.f32.mrf.mxu1 }
 0x657   :  { %v2399_v10 = vadd.f32 %v2533_v27, %v2398_v12 }
 0x658   :  { %v2989_v58 = vpop.f32.mrf.mxu1 }
 0x659   :  { %v2403_v30 = vsel %vm2402_vm5, %v2399_v10, -inf }
 0x65a   :  { %2404 = vmax.xlane.f32.xlu0 %v2403_v30 }
 0x6e3   :  { %v2405_v3 = vpop.xlane.xlu0 %2404 }
 0x6e4   :  { %v2406_v6 = vsub.f32 %v2399_v10, %v2405_v3 }
 0x6e6   :  { %v2407_v13 = vmul.f32 1.442695, %v2406_v6 }
 0x6e8   :  { %3122 = vpow2.f32 %v2407_v13 }
 0x6f5   :  { %v3123_v57 = vpop.eup %3122 }
 0x6f6   :  { %v2409_v56 = vsel %vm2402_vm5, %v3123_v57, 0.0 }
 0x6f7   :  { %2410 = vadd.xlane.f32.xlu0 %v2409_v56 }
 0x780   :  { %v2411_v5 = vpop.xlane.xlu0 %2410 }
 0x781   :  { %3124 = vlog2.f32 %v2411_v5 }
 0x78e   :  { %v3125_v23 = vpop.eup %3124 }
 0x78f   :  { %v2413_v35 = vmul.f32 0.6931472, %v3125_v23 }
 0x791   :  { %v2414_v14 = vsub.f32 %v2406_v6, %v2413_v35 }
 0x793   :  { %2415 = vst.msk [vmem:[%s4272_s10] sm:$0xff] %vm2402_vm5, %v2414_v14 }

</bundles_post_ra>
